<compile_context>
chip_gen: v7x
topology: tpu7x:2x2x1
jax: 0.10.0
libtpu: 0.0.40
codegen_flags: <defaults>
</compile_context>

<pallas_src>
import jax
import jax.numpy as jnp
from jax.experimental import pallas as pl
from jax.experimental.pallas import tpu as pltpu

CLASS_SIZE = 10        # CLASS_SIZE is None in the reference; pick a small deterministic value.
IN_FEATURES = 28 * 28  # 784
HIDDEN = 512
N_PAD = 128            # lane-dense padded logits width (>= CLASS_SIZE, multiple of 128)
MAX_BATCH_TILE = 512   # rows per batch block (per-step overhead amortization)


def _round_up(x, m):
    return ((x + m - 1) // m) * m


def _choose_tiles(B):
    """Return (Bp, bm): padded batch rows and batch-tile rows, with bm dividing Bp."""
    if B < 256:
        Bp = _round_up(max(B, 1), 16)   # 16: bf16-output sublane tiling; waste <= 15 rows
        return Bp, Bp                   # single tile (latency regime)
    Bp = _round_up(B, 128)              # caps padding waste at < 128 rows (not < bm rows)
    # Largest 128-multiple tile <= MAX_BATCH_TILE that divides Bp AND leaves >= 2 grid
    # steps, so v7x's two TensorCores both get work via the "parallel" batch axis.
    cap = max(128, min(MAX_BATCH_TILE, (Bp // 2) // 128 * 128))
    bm = 128
    for cand in range(cap, 0, -128):
        if Bp % cand == 0:
            bm = cand
            break
    return Bp, bm


def mlp_kernel(x_ref, w1_ref, b1_ref, w2_ref, b2_ref, w3_ref, b3_ref, o_ref):
    # Entire MLP hot path: 3 bf16 MXU matmuls with f32 accumulation, f32 bias-add and
    # ReLU on the VPU.  Biases are (1, N) f32 broadcast over the batch (sublane) axis.
    x = x_ref[...].astype(jnp.bfloat16)
    h1 = jnp.dot(x, w1_ref[...], preferred_element_type=jnp.float32) + b1_ref[...]
    h1 = jnp.maximum(h1, 0.0).astype(jnp.bfloat16)
    h2 = jnp.dot(h1, w2_ref[...], preferred_element_type=jnp.float32) + b2_ref[...]
    h2 = jnp.maximum(h2, 0.0).astype(jnp.bfloat16)
    logits = jnp.dot(h2, w3_ref[...], preferred_element_type=jnp.float32) + b3_ref[...]
    o_ref[...] = logits.astype(o_ref.dtype)   # lane-dense (bm, 128) bf16 store


def prepare_params(w1, b1, w2, b2, w3, b3):
    """One-time parameter prep (do NOT call per forward):
       PyTorch (out, in) -> (in, out), zero-pad layer-3 N to 128 lanes, cast weights to
       bf16, keep biases in f32 as (1, N).  Layer-1 K stays 784 (no K padding needed)."""
    w3_t = jnp.zeros((HIDDEN, N_PAD), jnp.float32).at[:, :CLASS_SIZE].set(w3.T)
    b3_p = jnp.zeros((1, N_PAD), jnp.float32).at[0, :CLASS_SIZE].set(b3)
    params = (
        w1.T.astype(jnp.bfloat16), b1.reshape(1, -1).astype(jnp.float32),
        w2.T.astype(jnp.bfloat16), b2.reshape(1, -1).astype(jnp.float32),
        w3_t.astype(jnp.bfloat16), b3_p,
    )
    return jax.tree_util.tree_map(jax.device_put, params)


@jax.jit
def small_mlp_forward(x_nchw, params):
    """x_nchw: [B, 1, 28, 28] float32. params: output of prepare_params.
       Returns logits [B, CLASS_SIZE] float32."""
    w1p, b1p, w2p, b2p, w3p, b3p = params
    B = x_nchw.shape[0]
    x_flat = x_nchw.reshape(B, IN_FEATURES)     # nn.Flatten (row-major, same as torch)

    Bp, bm = _choose_tiles(B)
    if Bp != B:
        # Row-only zero pad (no K padding); skipped entirely when B already divides.
        x_flat = jnp.pad(x_flat, ((0, Bp - B), (0, 0)))
    nb = Bp // bm

    flops = 2 * Bp * (IN_FEATURES * HIDDEN + HIDDEN * HIDDEN + HIDDEN * N_PAD)
    bytes_accessed = (
        Bp * IN_FEATURES * 4                     # f32 x read (no padded copy)
        + (w1p.size + w2p.size + w3p.size) * 2   # bf16 weights
        + (b1p.size + b2p.size + b3p.size) * 4   # f32 biases
        + Bp * N_PAD * 2                         # bf16 padded logits
    )

    # Weights/biases are resident full blocks (constant block index across the grid).
    resident = lambda a: pl.BlockSpec(a.shape, lambda i: (0, 0))

    out = pl.pallas_call(
        mlp_kernel,
        out_shape=jax.ShapeDtypeStruct((Bp, N_PAD), jnp.bfloat16),
        grid=(nb,),
        in_specs=[
            # (bm, 784): last dim equals full array dim, bm is a multiple of 16.
            pl.BlockSpec((bm, IN_FEATURES), lambda i: (i, 0)),
            resident(w1p), resident(b1p),
            resident(w2p), resident(b2p),
            resident(w3p), resident(b3p),
        ],
        out_specs=pl.BlockSpec((bm, N_PAD), lambda i: (i, 0)),
        compiler_params=pltpu.CompilerParams(dimension_semantics=("parallel",)),
        cost_estimate=pl.CostEstimate(
            flops=flops, transcendentals=0, bytes_accessed=bytes_accessed),
    )(x_flat, w1p, b1p, w2p, b2p, w3p, b3p)

    return out[:B, :CLASS_SIZE].astype(jnp.float32)


def init_linear(key, out_features, in_features):
    # Deterministic PyTorch-style init: U(-1/sqrt(in), 1/sqrt(in)) for W and b.
    kw, kb = jax.random.split(key)
    bound = 1.0 / jnp.sqrt(jnp.float32(in_features))
    w = jax.random.uniform(kw, (out_features, in_features), jnp.float32, -bound, bound)
    b = jax.random.uniform(kb, (out_features,), jnp.float32, -bound, bound)
    return w, b


if __name__ == "__main__":
    key = jax.random.PRNGKey(0)
    kx, k1, k2, k3 = jax.random.split(key, 4)

    B = 8
    x = jax.random.normal(kx, (B, 1, 28, 28), jnp.float32)

    w1, b1 = init_linear(k1, HIDDEN, IN_FEATURES)
    w2, b2 = init_linear(k2, HIDDEN, HIDDEN)
    w3, b3 = init_linear(k3, CLASS_SIZE, HIDDEN)

    params = prepare_params(w1, b1, w2, b2, w3, b3)  # one-time prep (transpose/pad/bf16)

    logits = small_mlp_forward(x, params)
    logits = jax.block_until_ready(logits)
    assert logits.shape == (B, CLASS_SIZE)

    # Reference in plain JAX with the SAME bf16 weight/activation quantization and f32
    # accumulation as the kernel (module semantics, quantized weights); kernel output
    # additionally passes through one bf16 round-trip on the logits.
    xf = x.reshape(B, -1).astype(jnp.bfloat16)
    w1b, w2b, w3b = (w1.T.astype(jnp.bfloat16), w2.T.astype(jnp.bfloat16),
                     w3.T.astype(jnp.bfloat16))
    h = jnp.maximum(jnp.dot(xf, w1b, preferred_element_type=jnp.float32) + b1, 0.0)
    h = jnp.maximum(jnp.dot(h.astype(jnp.bfloat16), w2b,
                            preferred_element_type=jnp.float32) + b2, 0.0)
    ref = jnp.dot(h.astype(jnp.bfloat16), w3b,
                  preferred_element_type=jnp.float32) + b3

    assert jnp.allclose(logits, ref, atol=2e-2, rtol=2e-2), (
        float(jnp.max(jnp.abs(logits - ref))))

    print("KERNEL_OK")
</pallas_src>

<mosaic_0001>
module attributes {stable_mosaic.version = 11 : i64} {
  func.func @mlp_kernel(%arg0: i32, %arg1: memref<16x784xf32, #tpu.memory_space<vmem>>, %arg2: memref<784x512xbf16, #tpu.memory_space<vmem>>, %arg3: memref<1x512xf32, #tpu.memory_space<vmem>>, %arg4: memref<512x512xbf16, #tpu.memory_space<vmem>>, %arg5: memref<1x512xf32, #tpu.memory_space<vmem>>, %arg6: memref<512x128xbf16, #tpu.memory_space<vmem>>, %arg7: memref<1x128xf32, #tpu.memory_space<vmem>>, %arg8: memref<16x128xbf16, #tpu.memory_space<vmem>>) attributes {dimension_semantics = [#tpu.dimension_semantics<parallel>], iteration_bounds = array<i64: 1>, scalar_prefetch = 0 : i64, scratch_operands = 0 : i64, tpu.core_type = #tpu.core_type<tc>, window_params = [{transform_indices = @transform_0, window_bounds = array<i64: 16, 784>}, {pipeline_mode = #tpu.pipeline_mode<synchronous>, transform_indices = @transform_1, window_bounds = array<i64: 784, 512>}, {pipeline_mode = #tpu.pipeline_mode<synchronous>, transform_indices = @transform_2, window_bounds = array<i64: 1, 512>}, {pipeline_mode = #tpu.pipeline_mode<synchronous>, transform_indices = @transform_3, window_bounds = array<i64: 512, 512>}, {pipeline_mode = #tpu.pipeline_mode<synchronous>, transform_indices = @transform_4, window_bounds = array<i64: 1, 512>}, {pipeline_mode = #tpu.pipeline_mode<synchronous>, transform_indices = @transform_5, window_bounds = array<i64: 512, 128>}, {pipeline_mode = #tpu.pipeline_mode<synchronous>, transform_indices = @transform_6, window_bounds = array<i64: 1, 128>}, {transform_indices = @transform_7, window_bounds = array<i64: 16, 128>}]} {
    %c0 = arith.constant 0 : index
    %c0_0 = arith.constant 0 : index
    %0 = vector.load %arg1[%c0, %c0_0] : memref<16x784xf32, #tpu.memory_space<vmem>>, vector<16x784xf32>
    %1 = arith.truncf %0 : vector<16x784xf32> to vector<16x784xbf16>
    %c0_1 = arith.constant 0 : index
    %c0_2 = arith.constant 0 : index
    %2 = vector.load %arg2[%c0_1, %c0_2] : memref<784x512xbf16, #tpu.memory_space<vmem>>, vector<784x512xbf16>
    %cst = arith.constant dense<0.000000e+00> : vector<16x512xf32>
    %3 = tpu.matmul %1, %2, %cst {dimension_numbers = #tpu.dot_dimension_numbers<[1], [0], [0], [1], [0, 0, 1, 1], [], []>} : vector<16x784xbf16>, vector<784x512xbf16>, vector<16x512xf32> -> vector<16x512xf32>
    %c0_3 = arith.constant 0 : index
    %c0_4 = arith.constant 0 : index
    %4 = vector.load %arg3[%c0_3, %c0_4] : memref<1x512xf32, #tpu.memory_space<vmem>>, vector<1x512xf32>
    %5 = vector.broadcast %4 : vector<1x512xf32> to vector<16x512xf32>
    %6 = arith.addf %3, %5 : vector<16x512xf32>
    %cst_5 = arith.constant 0.000000e+00 : f32
    %7 = vector.broadcast %cst_5 : f32 to vector<16x512xf32>
    %8 = arith.maximumf %6, %7 : vector<16x512xf32>
    %9 = arith.truncf %8 : vector<16x512xf32> to vector<16x512xbf16>
    %c0_6 = arith.constant 0 : index
    %c0_7 = arith.constant 0 : index
    %10 = vector.load %arg4[%c0_6, %c0_7] : memref<512x512xbf16, #tpu.memory_space<vmem>>, vector<512x512xbf16>
    %cst_8 = arith.constant dense<0.000000e+00> : vector<16x512xf32>
    %11 = tpu.matmul %9, %10, %cst_8 {dimension_numbers = #tpu.dot_dimension_numbers<[1], [0], [0], [1], [0, 0, 1, 1], [], []>} : vector<16x512xbf16>, vector<512x512xbf16>, vector<16x512xf32> -> vector<16x512xf32>
    %c0_9 = arith.constant 0 : index
    %c0_10 = arith.constant 0 : index
    %12 = vector.load %arg5[%c0_9, %c0_10] : memref<1x512xf32, #tpu.memory_space<vmem>>, vector<1x512xf32>
    %13 = vector.broadcast %12 : vector<1x512xf32> to vector<16x512xf32>
    %14 = arith.addf %11, %13 : vector<16x512xf32>
    %cst_11 = arith.constant 0.000000e+00 : f32
    %15 = vector.broadcast %cst_11 : f32 to vector<16x512xf32>
    %16 = arith.maximumf %14, %15 : vector<16x512xf32>
    %17 = arith.truncf %16 : vector<16x512xf32> to vector<16x512xbf16>
    %c0_12 = arith.constant 0 : index
    %c0_13 = arith.constant 0 : index
    %18 = vector.load %arg6[%c0_12, %c0_13] : memref<512x128xbf16, #tpu.memory_space<vmem>>, vector<512x128xbf16>
    %cst_14 = arith.constant dense<0.000000e+00> : vector<16x128xf32>
    %19 = tpu.matmul %17, %18, %cst_14 {dimension_numbers = #tpu.dot_dimension_numbers<[1], [0], [0], [1], [0, 0, 1, 1], [], []>} : vector<16x512xbf16>, vector<512x128xbf16>, vector<16x128xf32> -> vector<16x128xf32>
    %c0_15 = arith.constant 0 : index
    %c0_16 = arith.constant 0 : index
    %20 = vector.load %arg7[%c0_15, %c0_16] : memref<1x128xf32, #tpu.memory_space<vmem>>, vector<1x128xf32>
    %21 = vector.broadcast %20 : vector<1x128xf32> to vector<16x128xf32>
    %22 = arith.addf %19, %21 : vector<16x128xf32>
    %23 = arith.truncf %22 : vector<16x128xf32> to vector<16x128xbf16>
    %c0_17 = arith.constant 0 : index
    %c0_18 = arith.constant 0 : index
    %24 = vector.load %arg8[%c0_17, %c0_18] : memref<16x128xbf16, #tpu.memory_space<vmem>>, vector<16x128xbf16>
    tpu.vector_store %arg8[%c0_17, %c0_18], %23 {strides = array<i32>} : memref<16x128xbf16, #tpu.memory_space<vmem>>, vector<16x128xbf16>,
    return
  }
  func.func @transform_0(%arg0: i32) -> (i32, i32) {
    %c0_i32 = arith.constant 0 : i32
    %c0_i32_0 = arith.constant 0 : i32
    return %arg0, %c0_i32 : i32, i32
  }
  func.func @transform_1(%arg0: i32) -> (i32, i32) {
    %c0_i32 = arith.constant 0 : i32
    %c0_i32_0 = arith.constant 0 : i32
    %c0_i32_1 = arith.constant 0 : i32
    return %c0_i32, %c0_i32_0 : i32, i32
  }
  func.func @transform_2(%arg0: i32) -> (i32, i32) {
    %c0_i32 = arith.constant 0 : i32
    %c0_i32_0 = arith.constant 0 : i32
    %c0_i32_1 = arith.constant 0 : i32
    return %c0_i32, %c0_i32_0 : i32, i32
  }
  func.func @transform_3(%arg0: i32) -> (i32, i32) {
    %c0_i32 = arith.constant 0 : i32
    %c0_i32_0 = arith.constant 0 : i32
    %c0_i32_1 = arith.constant 0 : i32
    return %c0_i32, %c0_i32_0 : i32, i32
  }
  func.func @transform_4(%arg0: i32) -> (i32, i32) {
    %c0_i32 = arith.constant 0 : i32
    %c0_i32_0 = arith.constant 0 : i32
    %c0_i32_1 = arith.constant 0 : i32
    return %c0_i32, %c0_i32_0 : i32, i32
  }
  func.func @transform_5(%arg0: i32) -> (i32, i32) {
    %c0_i32 = arith.constant 0 : i32
    %c0_i32_0 = arith.constant 0 : i32
    %c0_i32_1 = arith.constant 0 : i32
    return %c0_i32, %c0_i32_0 : i32, i32
  }
  func.func @transform_6(%arg0: i32) -> (i32, i32) {
    %c0_i32 = arith.constant 0 : i32
    %c0_i32_0 = arith.constant 0 : i32
    %c0_i32_1 = arith.constant 0 : i32
    return %c0_i32, %c0_i32_0 : i32, i32
  }
  func.func @transform_7(%arg0: i32) -> (i32, i32) {
    %c0_i32 = arith.constant 0 : i32
    %c0_i32_0 = arith.constant 0 : i32
    return %arg0, %c0_i32 : i32, i32
  }
}

</mosaic_0001>

<bundles_post_ra>
// kernel: small_mlp_forward.1
= control target key start
LH: loop header
LB: loop body
LE: loop exit
PB: predicated region body
PF: predicated region fallthrough
CT: control target
= control target key end

     0   :  { %12 = vsyncpa [#allocation3], 0  ;;  %s4247_s0 = inlined_call_operand.vmem [shape: f32[16,784], index: 0, kind: input, shape index: {}]   ;;  %s4248_s1 = inlined_call_operand.hbm [shape: bf16[784,512], index: 1, kind: input, shape index: {}]   ;;  %s4249_s2 = inlined_call_operand.vmem [shape: f32[1,512], index: 2, kind: input, shape index: {}]   ;;  %s4250_s3 = inlined_call_operand.hbm [shape: bf16[512,512], index: 3, kind: input, shape index: {}]   ;;  %s4251_s4 = inlined_call_operand.vmem [shape: f32[1,512], index: 4, kind: input, shape index: {}]   ;;  %s4252_s5 = inlined_call_operand.vmem [shape: bf16[512,128], index: 5, kind: input, shape index: {}]   ;;  %s4253_s6 = inlined_call_operand.vmem [shape: f32[1,128], index: 6, kind: input, shape index: {}]   ;;  %s4254_s7 = inlined_call_operand.vmem [shape: bf16[16,128], index: 7, kind: output, shape index: {}]  }
   0x1   :  { %13 = vsyncpa [#allocation5], 0  ;;  %s4000_s24 = smov [#allocation2]   ;;  %s3952_s28 = scalar_lea.hbm %s4248_s1, 25088 }
   0x2   :  { %s21_s25 = sshll.u32 %s4000_s24, 4  ;;  %p3953_p0 = scmp.ne.s32.totalorder %s4248_s1, %s3952_s28  ;;  %s22_s25 = int_to_ptr.vmem [resolvable:$true] %s21_s25 }
   0x3   :  { %p3956_p1 = scmp.lt.u32.totalorder %s3952_s28, %s4248_s1 }
   0x5   :  { %p3958_p2 = pnand %p3956_p1, %p3953_p0 }
   0x7   :  { %3961 = shalt.err (!%p3958_p2)
}
   0x8   :  { %s3962_s10 = scalar_lea.vmem %s22_s25, 25088  ;;  %p3967_p4 = scmp.lt.s32.totalorder %s22_s25, %s22_s25 }
   0x9   :  { %p3963_p3 = scmp.ne.s32.totalorder %s22_s25, %s3962_s10  ;;  %p3968_p5 = scmp.lt.s32.totalorder %s3962_s10, %s3962_s10 }
   0xb   :  { %p3969_p6 = por %p3968_p5, %p3967_p4 }
   0xd   :  { %p3970_p7 = pnand %p3969_p6, %p3963_p3 }
   0xf   :  { %3973 = shalt.err (!%p3970_p7)
}
  0x10   :  { %s4001_s11 = smov 256   ;;  %s4002_s12 = smov 16  }
  0x11   :  { %27 = dma.hbm_to_vmem [thread:$0]  %s4248_s1, 25088, %s22_s25, [#allocation3], %s4001_s11, %s4001_s11, %s4002_s12  }
  0x12   :  { %s4003_s15 = smov [#allocation4]   ;;  %s3974_s19 = scalar_lea.hbm %s4250_s3, 16384 }
  0x13   :  { %s35_s16 = sshll.u32 %s4003_s15, 4  ;;  %p3975_p8 = scmp.ne.s32.totalorder %s4250_s3, %s3974_s19  ;;  %s36_s16 = int_to_ptr.vmem [resolvable:$true] %s35_s16 }
  0x14   :  { %p3978_p9 = scmp.lt.u32.totalorder %s3974_s19, %s4250_s3 }
  0x16   :  { %p3980_p10 = pnand %p3978_p9, %p3975_p8 }
  0x18   :  { %3983 = shalt.err (!%p3980_p10)
}
  0x19   :  { %s3984_s24 = scalar_lea.vmem %s36_s16, 16384  ;;  %p3989_p12 = scmp.lt.s32.totalorder %s36_s16, %s36_s16 }
  0x1a   :  { %p3985_p11 = scmp.ne.s32.totalorder %s36_s16, %s3984_s24  ;;  %p3990_p13 = scmp.lt.s32.totalorder %s3984_s24, %s3984_s24 }
  0x1c   :  { %p3991_p0 = por %p3990_p13, %p3989_p12 }
  0x1e   :  { %p3992_p1 = pnand %p3991_p0, %p3985_p11 }
  0x20   :  { %3995 = shalt.err (!%p3992_p1)
}
  0x21   :  { %41 = dma.hbm_to_vmem [thread:$0]  %s4250_s3, 16384, %s36_s16, [#allocation5], %s4001_s11, %s4001_s11, %s4002_s12  }
  0x22   :  { %3996 = dma.done.wait [#allocation3], 25088  }
  0x23   :  { %3997 = vsyncadd [#allocation3], 4294942208 }
  0x24   :  { %3998 = dma.done.wait [#allocation5], 16384  }
  0x25   :  { %3999 = vsyncadd [#allocation5], 4294950912  ;;  %v3434_v0 = vld [vmem:[#allocation2 + $0x4] ss:$16 sps:$4 sm:$0xff]   ;;  %v3436_v1 = vld [vmem:[#allocation2 + $0xc] ss:$16 sps:$4 sm:$0xff]  }
  0x26   :  { %1278 = vmatprep.subr.bf16.mxu0 %v3434_v0  ;;  %v3438_v2 = vld [vmem:[#allocation2] ss:$16 sps:$4 sm:$0xff]   ;;  %v3439_v3 = vld [vmem:[#allocation2 + $0x8] ss:$16 sps:$4 sm:$0xff]   ;;  %1450 = vmatprep.subr.bf16.mxu1 %v3436_v1  ;;  %v3440_v4 = vld [vmem:[#allocation2 + $0x24] ss:$16 sps:$4 sm:$0xff]  }
  0x27   :  { %1279 = vmatpush1.bf16.msra.mxu0 %v3438_v2  ;;  %1451 = vmatpush1.bf16.msra.mxu1 %v3439_v3  ;;  %v3442_v5 = vld [vmem:[#allocation2 + $0x2c] ss:$16 sps:$4 sm:$0xff]   ;;  %v3444_v6 = vld [vmem:[#allocation2 + $0x20] ss:$16 sps:$4 sm:$0xff]   ;;  %v3445_v7 = vld [vmem:[#allocation2 + $0x28] ss:$16 sps:$4 sm:$0xff]  }
  0x28   :  { %1280 = vmatprep.subr.bf16.mxu0 %v3440_v4  ;;  %1452 = vmatprep.subr.bf16.mxu1 %v3442_v5  ;;  %v3446_v8 = vld [vmem:[#allocation2 + $0x44] ss:$16 sps:$4 sm:$0xff]   ;;  %v3448_v9 = vld [vmem:[#allocation2 + $0x4c] ss:$16 sps:$4 sm:$0xff]   ;;  %v3450_v10 = vld [vmem:[#allocation2 + $0x40] ss:$16 sps:$4 sm:$0xff]  }
  0x29   :  { %v3451_v11 = vld [vmem:[#allocation2 + $0x48] ss:$16 sps:$4 sm:$0xff]   ;;  %v3452_v12 = vld [vmem:[#allocation2 + $0x64] ss:$16 sps:$4 sm:$0xff]   ;;  %v3454_v13 = vld [vmem:[#allocation2 + $0x6c] ss:$16 sps:$4 sm:$0xff]  }
  0x2a   :  { %v3456_v14 = vld [vmem:[#allocation2 + $0x60] ss:$16 sps:$4 sm:$0xff]   ;;  %v3457_v15 = vld [vmem:[#allocation2 + $0x68] ss:$16 sps:$4 sm:$0xff]   ;;  %v3458_v16 = vld [vmem:[#allocation2 + $0x84] ss:$16 sps:$4 sm:$0xff]  }
  0x2b   :  { %1281 = vmatpush1.bf16.msra.mxu0 %v3444_v6  ;;  %1453 = vmatpush1.bf16.msra.mxu1 %v3445_v7  ;;  %v3460_v17 = vld [vmem:[#allocation2 + $0x8c] ss:$16 sps:$4 sm:$0xff]   ;;  %v3462_v18 = vld [vmem:[#allocation2 + $0x80] ss:$16 sps:$4 sm:$0xff]   ;;  %v3463_v19 = vld [vmem:[#allocation2 + $0x88] ss:$16 sps:$4 sm:$0xff]  }
  0x2c   :  { %1282 = vmatprep.subr.bf16.mxu0 %v3446_v8  ;;  %1454 = vmatprep.subr.bf16.mxu1 %v3448_v9  ;;  %v3464_v20 = vld [vmem:[#allocation2 + $0xa4] ss:$16 sps:$4 sm:$0xff]   ;;  %v3466_v21 = vld [vmem:[#allocation2 + $0xac] ss:$16 sps:$4 sm:$0xff]   ;;  %v3468_v22 = vld [vmem:[#allocation2 + $0xa0] ss:$16 sps:$4 sm:$0xff]  }
  0x2d   :  { %v3469_v23 = vld [vmem:[#allocation2 + $0xa8] ss:$16 sps:$4 sm:$0xff]   ;;  %v3470_v24 = vld [vmem:[#allocation2 + $0xc4] ss:$16 sps:$4 sm:$0xff]   ;;  %v3472_v25 = vld [vmem:[#allocation2 + $0xcc] ss:$16 sps:$4 sm:$0xff]  }
  0x2e   :  { %v3474_v26 = vld [vmem:[#allocation2 + $0xc0] ss:$16 sps:$4 sm:$0xff]   ;;  %v3475_v27 = vld [vmem:[#allocation2 + $0xc8] ss:$16 sps:$4 sm:$0xff]   ;;  %v3476_v28 = vld [vmem:[#allocation2 + $0xe4] ss:$16 sps:$4 sm:$0xff]  }
  0x2f   :  { %1283 = vmatpush1.bf16.msra.mxu0 %v3450_v10  ;;  %1455 = vmatpush1.bf16.msra.mxu1 %v3451_v11  ;;  %v3478_v29 = vld [vmem:[#allocation2 + $0xec] ss:$16 sps:$4 sm:$0xff]   ;;  %v3480_v30 = vld [vmem:[#allocation2 + $0xe0] ss:$16 sps:$4 sm:$0xff]   ;;  %v3481_v31 = vld [vmem:[#allocation2 + $0xe8] ss:$16 sps:$4 sm:$0xff]  }
  0x30   :  { %1284 = vmatprep.subr.bf16.mxu0 %v3452_v12  ;;  %1456 = vmatprep.subr.bf16.mxu1 %v3454_v13  ;;  %v3482_v32 = vld [vmem:[#allocation2 + $0x104] ss:$16 sps:$4 sm:$0xff]   ;;  %v3484_v33 = vld [vmem:[#allocation2 + $0x10c] ss:$16 sps:$4 sm:$0xff]   ;;  %v3486_v34 = vld [vmem:[#allocation2 + $0x100] ss:$16 sps:$4 sm:$0xff]  }
  0x31   :  { %v3487_v35 = vld [vmem:[#allocation2 + $0x108] ss:$16 sps:$4 sm:$0xff]   ;;  %v3488_v36 = vld [vmem:[#allocation2 + $0x124] ss:$16 sps:$4 sm:$0xff]   ;;  %v3490_v37 = vld [vmem:[#allocation2 + $0x12c] ss:$16 sps:$4 sm:$0xff]  }
  0x32   :  { %v3492_v38 = vld [vmem:[#allocation2 + $0x120] ss:$16 sps:$4 sm:$0xff]   ;;  %v3493_v39 = vld [vmem:[#allocation2 + $0x128] ss:$16 sps:$4 sm:$0xff]   ;;  %v3494_v40 = vld [vmem:[#allocation2 + $0x144] ss:$16 sps:$4 sm:$0xff]  }
  0x33   :  { %1285 = vmatpush1.bf16.msra.mxu0 %v3456_v14  ;;  %1457 = vmatpush1.bf16.msra.mxu1 %v3457_v15  ;;  %v3496_v41 = vld [vmem:[#allocation2 + $0x14c] ss:$16 sps:$4 sm:$0xff]   ;;  %v3498_v42 = vld [vmem:[#allocation2 + $0x140] ss:$16 sps:$4 sm:$0xff]   ;;  %v3499_v43 = vld [vmem:[#allocation2 + $0x148] ss:$16 sps:$4 sm:$0xff]  }
  0x34   :  { %1286 = vmatprep.subr.bf16.mxu0 %v3458_v16  ;;  %1458 = vmatprep.subr.bf16.mxu1 %v3460_v17  ;;  %v3500_v44 = vld [vmem:[#allocation2 + $0x164] ss:$16 sps:$4 sm:$0xff]   ;;  %v3502_v45 = vld [vmem:[#allocation2 + $0x16c] ss:$16 sps:$4 sm:$0xff]   ;;  %v3504_v48 = vld [vmem:[#allocation2 + $0x160] ss:$16 sps:$4 sm:$0xff]  }
  0x35   :  { %v56_v46 = vld [vmem:[%s4247_s0 + $0x8] sm:$0xff]  ;;  %v63_v47 = vld [vmem:[%s4247_s0 + $0x40] sm:$0xff]  ;;  %v62_v5 = vld [vmem:[%s4247_s0 + $0x38] sm:$0xff]  ;;  %vm1274_vm0 = vcmask 130048  }
  0x36   :  { %v3505_v49 = vld [vmem:[#allocation2 + $0x168] ss:$16 sps:$4 sm:$0xff]   ;;  %v70_v50 = vpack.c.bf16 %v63_v47, %v56_v46  ;;  %v3506_v51 = vld [vmem:[#allocation2 + $0x184] ss:$16 sps:$4 sm:$0xff]   ;;  %v3508_v52 = vld [vmem:[#allocation2 + $0x18c] ss:$16 sps:$4 sm:$0xff]  }
  0x37   :  { %1287 = vmatpush1.bf16.msra.mxu0 %v3462_v18  ;;  %1459 = vmatpush1.bf16.msra.mxu1 %v3463_v19  ;;  %v3510_v53 = vld [vmem:[#allocation2 + $0x180] ss:$16 sps:$4 sm:$0xff]   ;;  %v3511_v54 = vld [vmem:[#allocation2 + $0x188] ss:$16 sps:$4 sm:$0xff]   ;;  %v3512_v55 = vld [vmem:[#allocation2 + $0x1a4] ss:$16 sps:$4 sm:$0xff]  }
  0x38   :  { %1288 = vmatprep.subr.bf16.mxu0 %v3464_v20  ;;  %1460 = vmatprep.subr.bf16.mxu1 %v3466_v21  ;;  %v3514_v56 = vld [vmem:[#allocation2 + $0x1ac] ss:$16 sps:$4 sm:$0xff]   ;;  %v3516_v57 = vld [vmem:[#allocation2 + $0x1a0] ss:$16 sps:$4 sm:$0xff]   ;;  %v3517_v58 = vld [vmem:[#allocation2 + $0x1a8] ss:$16 sps:$4 sm:$0xff]  }
  0x39   :  { %1310 = vmatprep.mubr.bf16.mxu0 %v70_v50  ;;  %1482 = vmatprep.mubr.bf16.mxu1 %v70_v50  ;;  %v3518_v59 = vld [vmem:[#allocation2 + $0x1c4] ss:$16 sps:$4 sm:$0xff]   ;;  %v3520_v60 = vld [vmem:[#allocation2 + $0x1cc] ss:$16 sps:$4 sm:$0xff]   ;;  %v3522_v61 = vld [vmem:[#allocation2 + $0x1c0] ss:$16 sps:$4 sm:$0xff]  }
  0x3a   :  { %v3523_v62 = vld [vmem:[#allocation2 + $0x1c8] ss:$16 sps:$4 sm:$0xff]   ;;  %v3524_v63 = vld [vmem:[#allocation2 + $0x1e4] ss:$16 sps:$4 sm:$0xff]   ;;  %v3526_v0 = vld [vmem:[#allocation2 + $0x1ec] ss:$16 sps:$4 sm:$0xff]  }
  0x3b   :  { %1289 = vmatpush1.bf16.msra.mxu0 %v3468_v22  ;;  %1461 = vmatpush1.bf16.msra.mxu1 %v3469_v23  ;;  %v3528_v1 = vld [vmem:[#allocation2 + $0x1e0] ss:$16 sps:$4 sm:$0xff]   ;;  %v3529_v2 = vld [vmem:[#allocation2 + $0x1e8] ss:$16 sps:$4 sm:$0xff]   ;;  %v3532_v3 = vld [vmem:[#allocation2 + $0x204] ss:$16 sps:$4 sm:$0xff]  }
  0x3c   :  { %1290 = vmatprep.subr.bf16.mxu0 %v3470_v24  ;;  %1462 = vmatprep.subr.bf16.mxu1 %v3472_v25  ;;  %v55_v4 = vld [vmem:[%s4247_s0] sm:$0xff]  ;;  %v3535_v6 = vld [vmem:[#allocation2 + $0x20c] ss:$16 sps:$4 sm:$0xff]   ;;  %v3533_v8 = vld [vmem:[#allocation2 + $0x208] ss:$16 sps:$4 sm:$0xff]  }
  0x3d   :  { %v3530_v7 = vld [vmem:[#allocation2 + $0x200] ss:$16 sps:$4 sm:$0xff]   ;;  %v69_v9 = vpack.c.bf16 %v62_v5, %v55_v4  ;;  %v3538_v10 = vld [vmem:[#allocation2 + $0x224] ss:$16 sps:$4 sm:$0xff]   ;;  %v3541_v11 = vld [vmem:[#allocation2 + $0x22c] ss:$16 sps:$4 sm:$0xff]  }
  0x3e   :  { %v3536_v12 = vld [vmem:[#allocation2 + $0x220] ss:$16 sps:$4 sm:$0xff]   ;;  %v3539_v13 = vld [vmem:[#allocation2 + $0x228] ss:$16 sps:$4 sm:$0xff]   ;;  %v3544_v14 = vld [vmem:[#allocation2 + $0x244] ss:$16 sps:$4 sm:$0xff]  }
  0x3f   :  { %1291 = vmatpush1.bf16.msra.mxu0 %v3474_v26  ;;  %1463 = vmatpush1.bf16.msra.mxu1 %v3475_v27  ;;  %v3547_v15 = vld [vmem:[#allocation2 + $0x24c] ss:$16 sps:$4 sm:$0xff]   ;;  %v3542_v16 = vld [vmem:[#allocation2 + $0x240] ss:$16 sps:$4 sm:$0xff]   ;;  %v3545_v17 = vld [vmem:[#allocation2 + $0x248] ss:$16 sps:$4 sm:$0xff]  }
  0x40   :  { %1292 = vmatprep.subr.bf16.mxu0 %v3476_v28  ;;  %1464 = vmatprep.subr.bf16.mxu1 %v3478_v29  ;;  %v3550_v18 = vld [vmem:[#allocation2 + $0x264] ss:$16 sps:$4 sm:$0xff]   ;;  %v3553_v19 = vld [vmem:[#allocation2 + $0x26c] ss:$16 sps:$4 sm:$0xff]   ;;  %v3548_v20 = vld [vmem:[#allocation2 + $0x260] ss:$16 sps:$4 sm:$0xff]  }
  0x41   :  { %v3551_v21 = vld [vmem:[#allocation2 + $0x268] ss:$16 sps:$4 sm:$0xff]   ;;  %v3556_v22 = vld [vmem:[#allocation2 + $0x284] ss:$16 sps:$4 sm:$0xff]   ;;  %v3559_v23 = vld [vmem:[#allocation2 + $0x28c] ss:$16 sps:$4 sm:$0xff]  }
  0x42   :  { %v3554_v24 = vld [vmem:[#allocation2 + $0x280] ss:$16 sps:$4 sm:$0xff]   ;;  %v3557_v25 = vld [vmem:[#allocation2 + $0x288] ss:$16 sps:$4 sm:$0xff]   ;;  %v3562_v26 = vld [vmem:[#allocation2 + $0x2a4] ss:$16 sps:$4 sm:$0xff]  }
  0x43   :  { %1293 = vmatpush1.bf16.msra.mxu0 %v3480_v30  ;;  %1465 = vmatpush1.bf16.msra.mxu1 %v3481_v31  ;;  %v3565_v27 = vld [vmem:[#allocation2 + $0x2ac] ss:$16 sps:$4 sm:$0xff]   ;;  %v3560_v28 = vld [vmem:[#allocation2 + $0x2a0] ss:$16 sps:$4 sm:$0xff]   ;;  %v3563_v29 = vld [vmem:[#allocation2 + $0x2a8] ss:$16 sps:$4 sm:$0xff]  }
  0x44   :  { %1294 = vmatprep.subr.bf16.mxu0 %v3482_v32  ;;  %1466 = vmatprep.subr.bf16.mxu1 %v3484_v33  ;;  %v3568_v30 = vld [vmem:[#allocation2 + $0x2c4] ss:$16 sps:$4 sm:$0xff]   ;;  %v3571_v31 = vld [vmem:[#allocation2 + $0x2cc] ss:$16 sps:$4 sm:$0xff]   ;;  %v3584_v47 = vld [vmem:[#allocation2 + $0x320] ss:$16 sps:$4 sm:$0xff]  }
  0x45   :  { %v58_v32 = vld [vmem:[%s4247_s0 + $0x18] sm:$0xff]  ;;  %v65_v33 = vld [vmem:[%s4247_s0 + $0x50] sm:$0xff] }
  0x46   :  { %v3589_v46 = vld [vmem:[#allocation2 + $0x32c] ss:$16 sps:$4 sm:$0xff]   ;;  %v3617_v4 = vld [vmem:[#allocation2 + $0x3c8] ss:$16 sps:$4 sm:$0xff]   ;;  %v3622_v5 = vld [vmem:[#allocation2 + $0x3e4] ss:$16 sps:$4 sm:$0xff]  }
  0x47   :  { %1295 = vmatpush1.bf16.msra.mxu0 %v3486_v34  ;;  %1467 = vmatpush1.bf16.msra.mxu1 %v3487_v35  ;;  %v3566_v34 = vld [vmem:[#allocation2 + $0x2c0] ss:$16 sps:$4 sm:$0xff]   ;;  %v3569_v35 = vld [vmem:[#allocation2 + $0x2c8] ss:$16 sps:$4 sm:$0xff]   ;;  %v3595_v50 = vld [vmem:[#allocation2 + $0x34c] ss:$16 sps:$4 sm:$0xff]  }
  0x48   :  { %1296 = vmatprep.subr.bf16.mxu0 %v3488_v36  ;;  %1468 = vmatprep.subr.bf16.mxu1 %v3490_v37  ;;  %v72_v36 = vpack.c.bf16 %v65_v33, %v58_v32  ;;  %v3574_v37 = vld [vmem:[#allocation2 + $0x2e4] ss:$16 sps:$4 sm:$0xff]   ;;  %v3655_v32 = vld [vmem:[#allocation2 + $0x48c] ss:$16 sps:$4 sm:$0xff]   ;;  %v3650_v33 = vld [vmem:[#allocation2 + $0x480] ss:$16 sps:$4 sm:$0xff]  }
  0x4b   :  { %1297 = vmatpush1.bf16.msra.mxu0 %v3492_v38  ;;  %1469 = vmatpush1.bf16.msra.mxu1 %v3493_v39  ;;  %v3577_v38 = vld [vmem:[#allocation2 + $0x2ec] ss:$16 sps:$4 sm:$0xff]   ;;  %v3572_v39 = vld [vmem:[#allocation2 + $0x2e0] ss:$16 sps:$4 sm:$0xff]  }
  0x4c   :  { %1298 = vmatprep.subr.bf16.mxu0 %v3494_v40  ;;  %1470 = vmatprep.subr.bf16.mxu1 %v3496_v41  ;;  %v3575_v40 = vld [vmem:[#allocation2 + $0x2e8] ss:$16 sps:$4 sm:$0xff]   ;;  %v3580_v41 = vld [vmem:[#allocation2 + $0x304] ss:$16 sps:$4 sm:$0xff]  }
  0x4f   :  { %1299 = vmatpush1.bf16.msra.mxu0 %v3498_v42  ;;  %1471 = vmatpush1.bf16.msra.mxu1 %v3499_v43  ;;  %v3583_v42 = vld [vmem:[#allocation2 + $0x30c] ss:$16 sps:$4 sm:$0xff]   ;;  %v3578_v43 = vld [vmem:[#allocation2 + $0x300] ss:$16 sps:$4 sm:$0xff]  }
  0x50   :  { %1300 = vmatprep.subr.bf16.mxu0 %v3500_v44  ;;  %1472 = vmatprep.subr.bf16.mxu1 %v3502_v45  ;;  %v3581_v44 = vld [vmem:[#allocation2 + $0x308] ss:$16 sps:$4 sm:$0xff]   ;;  %v3586_v45 = vld [vmem:[#allocation2 + $0x324] ss:$16 sps:$4 sm:$0xff]  }
  0x53   :  { %1301 = vmatpush1.bf16.msra.mxu0 %v3504_v48  ;;  %1473 = vmatpush1.bf16.msra.mxu1 %v3505_v49  ;;  %v3587_v48 = vld [vmem:[#allocation2 + $0x328] ss:$16 sps:$4 sm:$0xff]   ;;  %v3592_v49 = vld [vmem:[#allocation2 + $0x344] ss:$16 sps:$4 sm:$0xff]  }
  0x54   :  { %1302 = vmatprep.subr.bf16.mxu0 %v3506_v51  ;;  %1474 = vmatprep.subr.bf16.mxu1 %v3508_v52  ;;  %v3590_v51 = vld [vmem:[#allocation2 + $0x340] ss:$16 sps:$4 sm:$0xff]   ;;  %v3593_v52 = vld [vmem:[#allocation2 + $0x348] ss:$16 sps:$4 sm:$0xff]  }
  0x57   :  { %1303 = vmatpush1.bf16.msra.mxu0 %v3510_v53  ;;  %1475 = vmatpush1.bf16.msra.mxu1 %v3511_v54  ;;  %v3598_v53 = vld [vmem:[#allocation2 + $0x364] ss:$16 sps:$4 sm:$0xff]   ;;  %v3601_v54 = vld [vmem:[#allocation2 + $0x36c] ss:$16 sps:$4 sm:$0xff]  }
  0x58   :  { %1304 = vmatprep.subr.bf16.mxu0 %v3512_v55  ;;  %1476 = vmatprep.subr.bf16.mxu1 %v3514_v56  ;;  %v3596_v55 = vld [vmem:[#allocation2 + $0x360] ss:$16 sps:$4 sm:$0xff]   ;;  %v3599_v56 = vld [vmem:[#allocation2 + $0x368] ss:$16 sps:$4 sm:$0xff]  }
  0x5b   :  { %1305 = vmatpush1.bf16.msra.mxu0 %v3516_v57  ;;  %1477 = vmatpush1.bf16.msra.mxu1 %v3517_v58  ;;  %v3604_v57 = vld [vmem:[#allocation2 + $0x384] ss:$16 sps:$4 sm:$0xff]   ;;  %v3607_v58 = vld [vmem:[#allocation2 + $0x38c] ss:$16 sps:$4 sm:$0xff]  }
  0x5c   :  { %1306 = vmatprep.subr.bf16.mxu0 %v3518_v59  ;;  %1478 = vmatprep.subr.bf16.mxu1 %v3520_v60  ;;  %v3602_v59 = vld [vmem:[#allocation2 + $0x380] ss:$16 sps:$4 sm:$0xff]   ;;  %v3605_v60 = vld [vmem:[#allocation2 + $0x388] ss:$16 sps:$4 sm:$0xff]  }
  0x5f   :  { %1307 = vmatpush1.bf16.msra.mxu0 %v3522_v61  ;;  %1479 = vmatpush1.bf16.msra.mxu1 %v3523_v62  ;;  %v3610_v61 = vld [vmem:[#allocation2 + $0x3a4] ss:$16 sps:$4 sm:$0xff]   ;;  %v3613_v62 = vld [vmem:[#allocation2 + $0x3ac] ss:$16 sps:$4 sm:$0xff]  }
  0x60   :  { %1308 = vmatprep.subr.bf16.mxu0 %v3524_v63  ;;  %1480 = vmatprep.subr.bf16.mxu1 %v3526_v0  ;;  %v3608_v63 = vld [vmem:[#allocation2 + $0x3a0] ss:$16 sps:$4 sm:$0xff]   ;;  %v3611_v0 = vld [vmem:[#allocation2 + $0x3a8] ss:$16 sps:$4 sm:$0xff]  }
  0x63   :  { %1309 = vmatpush1.bf16.msra.mxu0 %v3528_v1  ;;  %1481 = vmatpush1.bf16.msra.mxu1 %v3529_v2  ;;  %v3616_v1 = vld [vmem:[#allocation2 + $0x3c4] ss:$16 sps:$4 sm:$0xff]   ;;  %v3619_v2 = vld [vmem:[#allocation2 + $0x3cc] ss:$16 sps:$4 sm:$0xff]  }
  0x64   :  { %1321 = vmatprep.subr.bf16.mxu0 %v3532_v3  ;;  %1493 = vmatprep.subr.bf16.mxu1 %v3535_v6  ;;  %v3614_v3 = vld [vmem:[#allocation2 + $0x3c0] ss:$16 sps:$4 sm:$0xff]   ;;  %v3625_v6 = vld [vmem:[#allocation2 + $0x3ec] ss:$16 sps:$4 sm:$0xff]  }
  0x66   :  { %1311 = vmatmul.mubr.bf16.vlgmr.msra.gmra.mrb[0].mxu0 %v69_v9  ;;  %1483 = vmatmul.mubr.bf16.vlgmr.msra.gmra.mrb[0].mxu1 %v69_v9  ;;  %v3628_v9 = vld [vmem:[#allocation2 + $0x404] ss:$16 sps:$4 sm:$0xff]  }
  0x67   :  { %1322 = vmatpush1.bf16.msra.mxu0 %v3530_v7  ;;  %1494 = vmatpush1.bf16.msra.mxu1 %v3533_v8  ;;  %v3620_v7 = vld [vmem:[#allocation2 + $0x3e0] ss:$16 sps:$4 sm:$0xff]   ;;  %v3623_v8 = vld [vmem:[#allocation2 + $0x3e8] ss:$16 sps:$4 sm:$0xff]  }
  0x68   :  { %1323 = vmatprep.subr.bf16.mxu0 %v3538_v10  ;;  %1495 = vmatprep.subr.bf16.mxu1 %v3541_v11  ;;  %v57_v10 = vld [vmem:[%s4247_s0 + $0x10] sm:$0xff]  ;;  %v64_v11 = vld [vmem:[%s4247_s0 + $0x48] sm:$0xff] }
  0x69   :  { %1353 = vmatprep.mubr.bf16.mxu0 %v72_v36  ;;  %1525 = vmatprep.mubr.bf16.mxu1 %v72_v36  ;;  %v3661_v36 = vld [vmem:[#allocation2 + $0x4ac] ss:$16 sps:$4 sm:$0xff]  }
  0x6b   :  { %1324 = vmatpush1.bf16.msra.mxu0 %v3536_v12  ;;  %1496 = vmatpush1.bf16.msra.mxu1 %v3539_v13  ;;  %v3631_v12 = vld [vmem:[#allocation2 + $0x40c] ss:$16 sps:$4 sm:$0xff]   ;;  %v3626_v13 = vld [vmem:[#allocation2 + $0x400] ss:$16 sps:$4 sm:$0xff]  }
  0x6c   :  { %1325 = vmatprep.subr.bf16.mxu0 %v3544_v14  ;;  %1497 = vmatprep.subr.bf16.mxu1 %v3547_v15  ;;  %v3629_v14 = vld [vmem:[#allocation2 + $0x408] ss:$16 sps:$4 sm:$0xff]   ;;  %v71_v15 = vpack.c.bf16 %v64_v11, %v57_v10  ;;  %v3718_v11 = vld [vmem:[#allocation2 + $0x5e4] ss:$16 sps:$4 sm:$0xff]  }
  0x6d   :  { %v3713_v10 = vld [vmem:[#allocation2 + $0x5c8] ss:$16 sps:$4 sm:$0xff]  }
  0x6f   :  { %1326 = vmatpush1.bf16.msra.mxu0 %v3542_v16  ;;  %1498 = vmatpush1.bf16.msra.mxu1 %v3545_v17  ;;  %v3634_v16 = vld [vmem:[#allocation2 + $0x424] ss:$16 sps:$4 sm:$0xff]   ;;  %v3637_v17 = vld [vmem:[#allocation2 + $0x42c] ss:$16 sps:$4 sm:$0xff]  }
  0x70   :  { %1327 = vmatprep.subr.bf16.mxu0 %v3550_v18  ;;  %1499 = vmatprep.subr.bf16.mxu1 %v3553_v19  ;;  %v60_v18 = vld [vmem:[%s4247_s0 + $0x28] sm:$0xff]  ;;  %v3632_v19 = vld [vmem:[#allocation2 + $0x420] ss:$16 sps:$4 sm:$0xff]  }
  0x73   :  { %1328 = vmatpush1.bf16.msra.mxu0 %v3548_v20  ;;  %1500 = vmatpush1.bf16.msra.mxu1 %v3551_v21  ;;  %v3635_v20 = vld [vmem:[#allocation2 + $0x428] ss:$16 sps:$4 sm:$0xff]   ;;  %v67_v21 = vld [vmem:[%s4247_s0 + $0x60] sm:$0xff] }
  0x74   :  { %1329 = vmatprep.subr.bf16.mxu0 %v3556_v22  ;;  %1501 = vmatprep.subr.bf16.mxu1 %v3559_v23  ;;  %v3640_v22 = vld [vmem:[#allocation2 + $0x444] ss:$16 sps:$4 sm:$0xff]   ;;  %v74_v23 = vpack.c.bf16 %v67_v21, %v60_v18  ;;  %v3727_v18 = vld [vmem:[#allocation2 + $0x60c] ss:$16 sps:$4 sm:$0xff]  }
  0x77   :  { %1330 = vmatpush1.bf16.msra.mxu0 %v3554_v24  ;;  %1502 = vmatpush1.bf16.msra.mxu1 %v3557_v25  ;;  %v3643_v24 = vld [vmem:[#allocation2 + $0x44c] ss:$16 sps:$4 sm:$0xff]   ;;  %v3638_v25 = vld [vmem:[#allocation2 + $0x440] ss:$16 sps:$4 sm:$0xff]  }
  0x78   :  { %1331 = vmatprep.subr.bf16.mxu0 %v3562_v26  ;;  %1503 = vmatprep.subr.bf16.mxu1 %v3565_v27  ;;  %v3641_v26 = vld [vmem:[#allocation2 + $0x448] ss:$16 sps:$4 sm:$0xff]   ;;  %v3646_v27 = vld [vmem:[#allocation2 + $0x464] ss:$16 sps:$4 sm:$0xff]  }
  0x7b   :  { %1332 = vmatpush1.bf16.msra.mxu0 %v3560_v28  ;;  %1504 = vmatpush1.bf16.msra.mxu1 %v3563_v29  ;;  %v3649_v28 = vld [vmem:[#allocation2 + $0x46c] ss:$16 sps:$4 sm:$0xff]   ;;  %v3644_v29 = vld [vmem:[#allocation2 + $0x460] ss:$16 sps:$4 sm:$0xff]  }
  0x7c   :  { %1333 = vmatprep.subr.bf16.mxu0 %v3568_v30  ;;  %1505 = vmatprep.subr.bf16.mxu1 %v3571_v31  ;;  %v3647_v30 = vld [vmem:[#allocation2 + $0x468] ss:$16 sps:$4 sm:$0xff]   ;;  %v3652_v31 = vld [vmem:[#allocation2 + $0x484] ss:$16 sps:$4 sm:$0xff]  }
  0x7f   :  { %1334 = vmatpush1.bf16.msra.mxu0 %v3566_v34  ;;  %1506 = vmatpush1.bf16.msra.mxu1 %v3569_v35  ;;  %v3653_v34 = vld [vmem:[#allocation2 + $0x488] ss:$16 sps:$4 sm:$0xff]   ;;  %v3658_v35 = vld [vmem:[#allocation2 + $0x4a4] ss:$16 sps:$4 sm:$0xff]  }
  0x80   :  { %1335 = vmatprep.subr.bf16.mxu0 %v3574_v37  ;;  %1507 = vmatprep.subr.bf16.mxu1 %v3577_v38  ;;  %v3656_v37 = vld [vmem:[#allocation2 + $0x4a0] ss:$16 sps:$4 sm:$0xff]   ;;  %v3659_v38 = vld [vmem:[#allocation2 + $0x4a8] ss:$16 sps:$4 sm:$0xff]  }
  0x83   :  { %1336 = vmatpush1.bf16.msra.mxu0 %v3572_v39  ;;  %1508 = vmatpush1.bf16.msra.mxu1 %v3575_v40  ;;  %v3664_v39 = vld [vmem:[#allocation2 + $0x4c4] ss:$16 sps:$4 sm:$0xff]   ;;  %v3667_v40 = vld [vmem:[#allocation2 + $0x4cc] ss:$16 sps:$4 sm:$0xff]  }
  0x84   :  { %1337 = vmatprep.subr.bf16.mxu0 %v3580_v41  ;;  %1509 = vmatprep.subr.bf16.mxu1 %v3583_v42  ;;  %v3662_v41 = vld [vmem:[#allocation2 + $0x4c0] ss:$16 sps:$4 sm:$0xff]   ;;  %v3665_v42 = vld [vmem:[#allocation2 + $0x4c8] ss:$16 sps:$4 sm:$0xff]  }
  0x87   :  { %1338 = vmatpush1.bf16.msra.mxu0 %v3578_v43  ;;  %1510 = vmatpush1.bf16.msra.mxu1 %v3581_v44  ;;  %v3670_v43 = vld [vmem:[#allocation2 + $0x4e4] ss:$16 sps:$4 sm:$0xff]   ;;  %v3673_v44 = vld [vmem:[#allocation2 + $0x4ec] ss:$16 sps:$4 sm:$0xff]  }
  0x88   :  { %1339 = vmatprep.subr.bf16.mxu0 %v3586_v45  ;;  %1511 = vmatprep.subr.bf16.mxu1 %v3589_v46  ;;  %v3668_v45 = vld [vmem:[#allocation2 + $0x4e0] ss:$16 sps:$4 sm:$0xff]   ;;  %v3671_v46 = vld [vmem:[#allocation2 + $0x4e8] ss:$16 sps:$4 sm:$0xff]  }
  0x8b   :  { %1340 = vmatpush1.bf16.msra.mxu0 %v3584_v47  ;;  %1512 = vmatpush1.bf16.msra.mxu1 %v3587_v48  ;;  %v3676_v47 = vld [vmem:[#allocation2 + $0x504] ss:$16 sps:$4 sm:$0xff]   ;;  %v3679_v48 = vld [vmem:[#allocation2 + $0x50c] ss:$16 sps:$4 sm:$0xff]  }
  0x8c   :  { %1341 = vmatprep.subr.bf16.mxu0 %v3592_v49  ;;  %1513 = vmatprep.subr.bf16.mxu1 %v3595_v50  ;;  %v3674_v49 = vld [vmem:[#allocation2 + $0x500] ss:$16 sps:$4 sm:$0xff]   ;;  %v3677_v50 = vld [vmem:[#allocation2 + $0x508] ss:$16 sps:$4 sm:$0xff]  }
  0x8f   :  { %1342 = vmatpush1.bf16.msra.mxu0 %v3590_v51  ;;  %1514 = vmatpush1.bf16.msra.mxu1 %v3593_v52  ;;  %v3682_v51 = vld [vmem:[#allocation2 + $0x524] ss:$16 sps:$4 sm:$0xff]   ;;  %v3685_v52 = vld [vmem:[#allocation2 + $0x52c] ss:$16 sps:$4 sm:$0xff]  }
  0x90   :  { %1343 = vmatprep.subr.bf16.mxu0 %v3598_v53  ;;  %1515 = vmatprep.subr.bf16.mxu1 %v3601_v54  ;;  %v3680_v53 = vld [vmem:[#allocation2 + $0x520] ss:$16 sps:$4 sm:$0xff]   ;;  %v3683_v54 = vld [vmem:[#allocation2 + $0x528] ss:$16 sps:$4 sm:$0xff]  }
  0x93   :  { %1344 = vmatpush1.bf16.msra.mxu0 %v3596_v55  ;;  %1516 = vmatpush1.bf16.msra.mxu1 %v3599_v56  ;;  %v3688_v55 = vld [vmem:[#allocation2 + $0x544] ss:$16 sps:$4 sm:$0xff]   ;;  %v3691_v56 = vld [vmem:[#allocation2 + $0x54c] ss:$16 sps:$4 sm:$0xff]  }
  0x94   :  { %1345 = vmatprep.subr.bf16.mxu0 %v3604_v57  ;;  %1517 = vmatprep.subr.bf16.mxu1 %v3607_v58  ;;  %v3686_v57 = vld [vmem:[#allocation2 + $0x540] ss:$16 sps:$4 sm:$0xff]   ;;  %v3689_v58 = vld [vmem:[#allocation2 + $0x548] ss:$16 sps:$4 sm:$0xff]  }
  0x97   :  { %1346 = vmatpush1.bf16.msra.mxu0 %v3602_v59  ;;  %1518 = vmatpush1.bf16.msra.mxu1 %v3605_v60  ;;  %v3694_v59 = vld [vmem:[#allocation2 + $0x564] ss:$16 sps:$4 sm:$0xff]   ;;  %v3697_v60 = vld [vmem:[#allocation2 + $0x56c] ss:$16 sps:$4 sm:$0xff]  }
  0x98   :  { %1347 = vmatprep.subr.bf16.mxu0 %v3610_v61  ;;  %1519 = vmatprep.subr.bf16.mxu1 %v3613_v62  ;;  %v3692_v61 = vld [vmem:[#allocation2 + $0x560] ss:$16 sps:$4 sm:$0xff]   ;;  %v3695_v62 = vld [vmem:[#allocation2 + $0x568] ss:$16 sps:$4 sm:$0xff]  }
  0x9b   :  { %1348 = vmatpush1.bf16.msra.mxu0 %v3608_v63  ;;  %1520 = vmatpush1.bf16.msra.mxu1 %v3611_v0  ;;  %v3700_v63 = vld [vmem:[#allocation2 + $0x584] ss:$16 sps:$4 sm:$0xff]   ;;  %v3703_v0 = vld [vmem:[#allocation2 + $0x58c] ss:$16 sps:$4 sm:$0xff]  }
  0x9c   :  { %1349 = vmatprep.subr.bf16.mxu0 %v3616_v1  ;;  %1521 = vmatprep.subr.bf16.mxu1 %v3619_v2  ;;  %v3698_v1 = vld [vmem:[#allocation2 + $0x580] ss:$16 sps:$4 sm:$0xff]   ;;  %v3701_v2 = vld [vmem:[#allocation2 + $0x588] ss:$16 sps:$4 sm:$0xff]  }
  0x9f   :  { %1350 = vmatpush1.bf16.msra.mxu0 %v3614_v3  ;;  %1522 = vmatpush1.bf16.msra.mxu1 %v3617_v4  ;;  %v3706_v3 = vld [vmem:[#allocation2 + $0x5a4] ss:$16 sps:$4 sm:$0xff]   ;;  %v3709_v4 = vld [vmem:[#allocation2 + $0x5ac] ss:$16 sps:$4 sm:$0xff]  }
  0xa0   :  { %1351 = vmatprep.subr.bf16.mxu0 %v3622_v5  ;;  %1523 = vmatprep.subr.bf16.mxu1 %v3625_v6  ;;  %v3704_v5 = vld [vmem:[#allocation2 + $0x5a0] ss:$16 sps:$4 sm:$0xff]   ;;  %v3707_v6 = vld [vmem:[#allocation2 + $0x5a8] ss:$16 sps:$4 sm:$0xff]  }
  0xa3   :  { %1352 = vmatpush1.bf16.msra.mxu0 %v3620_v7  ;;  %1524 = vmatpush1.bf16.msra.mxu1 %v3623_v8  ;;  %v3712_v7 = vld [vmem:[#allocation2 + $0x5c4] ss:$16 sps:$4 sm:$0xff]   ;;  %v3715_v8 = vld [vmem:[#allocation2 + $0x5cc] ss:$16 sps:$4 sm:$0xff]  }
  0xa4   :  { %1364 = vmatprep.subr.bf16.mxu0 %v3628_v9  ;;  %1536 = vmatprep.subr.bf16.mxu1 %v3631_v12  ;;  %v3710_v9 = vld [vmem:[#allocation2 + $0x5c0] ss:$16 sps:$4 sm:$0xff]   ;;  %v3721_v12 = vld [vmem:[#allocation2 + $0x5ec] ss:$16 sps:$4 sm:$0xff]  }
  0xa6   :  { %1354 = vmatmul.mubr.bf16.vlgmr.msra.gmra.mrb[0].mxu0 %v71_v15  ;;  %1526 = vmatmul.mubr.bf16.vlgmr.msra.gmra.mrb[0].mxu1 %v71_v15  ;;  %v59_v15 = vld [vmem:[%s4247_s0 + $0x20] sm:$0xff] }
  0xa7   :  { %1365 = vmatpush1.bf16.msra.mxu0 %v3626_v13  ;;  %1537 = vmatpush1.bf16.msra.mxu1 %v3629_v14  ;;  %v3716_v13 = vld [vmem:[#allocation2 + $0x5e0] ss:$16 sps:$4 sm:$0xff]   ;;  %v3719_v14 = vld [vmem:[#allocation2 + $0x5e8] ss:$16 sps:$4 sm:$0xff]  }
  0xa8   :  { %1366 = vmatprep.subr.bf16.mxu0 %v3634_v16  ;;  %1538 = vmatprep.subr.bf16.mxu1 %v3637_v17  ;;  %v66_v16 = vld [vmem:[%s4247_s0 + $0x58] sm:$0xff]  ;;  %v3724_v17 = vld [vmem:[#allocation2 + $0x604] ss:$16 sps:$4 sm:$0xff]  }
  0xa9   :  { %1396 = vmatprep.mubr.bf16.mxu0 %v74_v23  ;;  %1568 = vmatprep.mubr.bf16.mxu1 %v74_v23  ;;  %v73_v21 = vpack.c.bf16 %v66_v16, %v59_v15  ;;  %v3733_v23 = vld [vmem:[#allocation4 + $0xc] ss:$16 sps:$4 sm:$0xff]   ;;  %v3806_v16 = vld [vmem:[#allocation4 + $0x1a0] ss:$16 sps:$4 sm:$0xff]  }
  0xaa   :  { %v3811_v15 = vld [vmem:[#allocation4 + $0x1ac] ss:$16 sps:$4 sm:$0xff]  }
  0xab   :  { %1367 = vmatpush1.bf16.msra.mxu0 %v3632_v19  ;;  %1539 = vmatpush1.bf16.msra.mxu1 %v3635_v20  ;;  %v3722_v19 = vld [vmem:[#allocation2 + $0x600] ss:$16 sps:$4 sm:$0xff]   ;;  %v3725_v20 = vld [vmem:[#allocation2 + $0x608] ss:$16 sps:$4 sm:$0xff]  }
  0xac   :  { %1368 = vmatprep.subr.bf16.mxu0 %v3640_v22  ;;  %1540 = vmatprep.subr.bf16.mxu1 %v3643_v24  ;;  %v3730_v22 = vld [vmem:[#allocation4 + $0x4] ss:$16 sps:$4 sm:$0xff]   ;;  %v4004_v24 = vmov 0  }
  0xaf   :  { %1369 = vmatpush1.bf16.msra.mxu0 %v3638_v25  ;;  %1541 = vmatpush1.bf16.msra.mxu1 %v3641_v26  ;;  %v61_v25 = vld [vmem:[%s4247_s0 + $0x30] sm:$0xff]  ;;  %v68_v26 = vld [vmem:[%s4247_s0 + $0x68] sm:$0xff] }
  0xb0   :  { %1370 = vmatprep.subr.bf16.mxu0 %v3646_v27  ;;  %1542 = vmatprep.subr.bf16.mxu1 %v3649_v28  ;;  %v3728_v27 = vld [vmem:[#allocation4] ss:$16 sps:$4 sm:$0xff]   ;;  %v3731_v28 = vld [vmem:[#allocation4 + $0x8] ss:$16 sps:$4 sm:$0xff]  }
  0xb3   :  { %1371 = vmatpush1.bf16.msra.mxu0 %v3644_v29  ;;  %1543 = vmatpush1.bf16.msra.mxu1 %v3647_v30  ;;  %v75_v29 = vpack.c.bf16 %v68_v26, %v61_v25  ;;  %v3736_v30 = vld [vmem:[#allocation4 + $0x24] ss:$16 sps:$4 sm:$0xff]   ;;  %v3821_v25 = vld [vmem:[#allocation4 + $0x1e8] ss:$16 sps:$4 sm:$0xff]  }
  0xb4   :  { %1372 = vmatprep.subr.bf16.mxu0 %v3652_v31  ;;  %1544 = vmatprep.subr.bf16.mxu1 %v3655_v32  ;;  %v3739_v31 = vld [vmem:[#allocation4 + $0x2c] ss:$16 sps:$4 sm:$0xff]   ;;  %v3734_v32 = vld [vmem:[#allocation4 + $0x20] ss:$16 sps:$4 sm:$0xff]   ;;  %v3826_v26 = vld [vmem:[#allocation4 + $0x204] ss:$16 sps:$4 sm:$0xff]  }
  0xb7   :  { %1373 = vmatpush1.bf16.msra.mxu0 %v3650_v33  ;;  %1545 = vmatpush1.bf16.msra.mxu1 %v3653_v34  ;;  %v3737_v33 = vld [vmem:[#allocation4 + $0x28] ss:$16 sps:$4 sm:$0xff]   ;;  %v3742_v34 = vld [vmem:[#allocation4 + $0x44] ss:$16 sps:$4 sm:$0xff]  }
  0xb8   :  { %1374 = vmatprep.subr.bf16.mxu0 %v3658_v35  ;;  %1546 = vmatprep.subr.bf16.mxu1 %v3661_v36  ;;  %v3745_v35 = vld [vmem:[#allocation4 + $0x4c] ss:$16 sps:$4 sm:$0xff]   ;;  %v3740_v36 = vld [vmem:[#allocation4 + $0x40] ss:$16 sps:$4 sm:$0xff]  }
  0xbb   :  { %1375 = vmatpush1.bf16.msra.mxu0 %v3656_v37  ;;  %1547 = vmatpush1.bf16.msra.mxu1 %v3659_v38  ;;  %v3743_v37 = vld [vmem:[#allocation4 + $0x48] ss:$16 sps:$4 sm:$0xff]   ;;  %v3748_v38 = vld [vmem:[#allocation4 + $0x64] ss:$16 sps:$4 sm:$0xff]  }
  0xbc   :  { %1376 = vmatprep.subr.bf16.mxu0 %v3664_v39  ;;  %1548 = vmatprep.subr.bf16.mxu1 %v3667_v40  ;;  %v3751_v39 = vld [vmem:[#allocation4 + $0x6c] ss:$16 sps:$4 sm:$0xff]   ;;  %v3746_v40 = vld [vmem:[#allocation4 + $0x60] ss:$16 sps:$4 sm:$0xff]  }
  0xbf   :  { %1377 = vmatpush1.bf16.msra.mxu0 %v3662_v41  ;;  %1549 = vmatpush1.bf16.msra.mxu1 %v3665_v42  ;;  %v3749_v41 = vld [vmem:[#allocation4 + $0x68] ss:$16 sps:$4 sm:$0xff]   ;;  %v3754_v42 = vld [vmem:[#allocation4 + $0x84] ss:$16 sps:$4 sm:$0xff]  }
  0xc0   :  { %1378 = vmatprep.subr.bf16.mxu0 %v3670_v43  ;;  %1550 = vmatprep.subr.bf16.mxu1 %v3673_v44  ;;  %v3757_v43 = vld [vmem:[#allocation4 + $0x8c] ss:$16 sps:$4 sm:$0xff]   ;;  %v3752_v44 = vld [vmem:[#allocation4 + $0x80] ss:$16 sps:$4 sm:$0xff]  }
  0xc3   :  { %1379 = vmatpush1.bf16.msra.mxu0 %v3668_v45  ;;  %1551 = vmatpush1.bf16.msra.mxu1 %v3671_v46  ;;  %v3755_v45 = vld [vmem:[#allocation4 + $0x88] ss:$16 sps:$4 sm:$0xff]   ;;  %v3760_v46 = vld [vmem:[#allocation4 + $0xa4] ss:$16 sps:$4 sm:$0xff]  }
  0xc4   :  { %1380 = vmatprep.subr.bf16.mxu0 %v3676_v47  ;;  %1552 = vmatprep.subr.bf16.mxu1 %v3679_v48  ;;  %v3763_v47 = vld [vmem:[#allocation4 + $0xac] ss:$16 sps:$4 sm:$0xff]   ;;  %v3758_v48 = vld [vmem:[#allocation4 + $0xa0] ss:$16 sps:$4 sm:$0xff]  }
  0xc7   :  { %1381 = vmatpush1.bf16.msra.mxu0 %v3674_v49  ;;  %1553 = vmatpush1.bf16.msra.mxu1 %v3677_v50  ;;  %v3761_v49 = vld [vmem:[#allocation4 + $0xa8] ss:$16 sps:$4 sm:$0xff]   ;;  %v3766_v50 = vld [vmem:[#allocation4 + $0xc4] ss:$16 sps:$4 sm:$0xff]  }
  0xc8   :  { %1382 = vmatprep.subr.bf16.mxu0 %v3682_v51  ;;  %1554 = vmatprep.subr.bf16.mxu1 %v3685_v52  ;;  %v3769_v51 = vld [vmem:[#allocation4 + $0xcc] ss:$16 sps:$4 sm:$0xff]   ;;  %v3764_v52 = vld [vmem:[#allocation4 + $0xc0] ss:$16 sps:$4 sm:$0xff]  }
  0xcb   :  { %1383 = vmatpush1.bf16.msra.mxu0 %v3680_v53  ;;  %1555 = vmatpush1.bf16.msra.mxu1 %v3683_v54  ;;  %v3767_v53 = vld [vmem:[#allocation4 + $0xc8] ss:$16 sps:$4 sm:$0xff]   ;;  %v3772_v54 = vld [vmem:[#allocation4 + $0xe4] ss:$16 sps:$4 sm:$0xff]  }
  0xcc   :  { %1384 = vmatprep.subr.bf16.mxu0 %v3688_v55  ;;  %1556 = vmatprep.subr.bf16.mxu1 %v3691_v56  ;;  %v3775_v55 = vld [vmem:[#allocation4 + $0xec] ss:$16 sps:$4 sm:$0xff]   ;;  %v3770_v56 = vld [vmem:[#allocation4 + $0xe0] ss:$16 sps:$4 sm:$0xff]  }
  0xcf   :  { %1385 = vmatpush1.bf16.msra.mxu0 %v3686_v57  ;;  %1557 = vmatpush1.bf16.msra.mxu1 %v3689_v58  ;;  %v3773_v57 = vld [vmem:[#allocation4 + $0xe8] ss:$16 sps:$4 sm:$0xff]   ;;  %v3778_v58 = vld [vmem:[#allocation4 + $0x104] ss:$16 sps:$4 sm:$0xff]  }
  0xd0   :  { %1386 = vmatprep.subr.bf16.mxu0 %v3694_v59  ;;  %1558 = vmatprep.subr.bf16.mxu1 %v3697_v60  ;;  %v3781_v59 = vld [vmem:[#allocation4 + $0x10c] ss:$16 sps:$4 sm:$0xff]   ;;  %v3776_v60 = vld [vmem:[#allocation4 + $0x100] ss:$16 sps:$4 sm:$0xff]  }
  0xd3   :  { %1387 = vmatpush1.bf16.msra.mxu0 %v3692_v61  ;;  %1559 = vmatpush1.bf16.msra.mxu1 %v3695_v62  ;;  %v3779_v61 = vld [vmem:[#allocation4 + $0x108] ss:$16 sps:$4 sm:$0xff]   ;;  %v3784_v62 = vld [vmem:[#allocation4 + $0x124] ss:$16 sps:$4 sm:$0xff]  }
  0xd4   :  { %1388 = vmatprep.subr.bf16.mxu0 %v3700_v63  ;;  %1560 = vmatprep.subr.bf16.mxu1 %v3703_v0  ;;  %v3787_v63 = vld [vmem:[#allocation4 + $0x12c] ss:$16 sps:$4 sm:$0xff]   ;;  %v3782_v0 = vld [vmem:[#allocation4 + $0x120] ss:$16 sps:$4 sm:$0xff]  }
  0xd7   :  { %1389 = vmatpush1.bf16.msra.mxu0 %v3698_v1  ;;  %1561 = vmatpush1.bf16.msra.mxu1 %v3701_v2  ;;  %v3785_v1 = vld [vmem:[#allocation4 + $0x128] ss:$16 sps:$4 sm:$0xff]   ;;  %v3790_v2 = vld [vmem:[#allocation4 + $0x144] ss:$16 sps:$4 sm:$0xff]  }
  0xd8   :  { %1390 = vmatprep.subr.bf16.mxu0 %v3706_v3  ;;  %1562 = vmatprep.subr.bf16.mxu1 %v3709_v4  ;;  %v3793_v3 = vld [vmem:[#allocation4 + $0x14c] ss:$16 sps:$4 sm:$0xff]   ;;  %v3788_v4 = vld [vmem:[#allocation4 + $0x140] ss:$16 sps:$4 sm:$0xff]  }
  0xdb   :  { %1391 = vmatpush1.bf16.msra.mxu0 %v3704_v5  ;;  %1563 = vmatpush1.bf16.msra.mxu1 %v3707_v6  ;;  %v3791_v5 = vld [vmem:[#allocation4 + $0x148] ss:$16 sps:$4 sm:$0xff]   ;;  %v3796_v6 = vld [vmem:[#allocation4 + $0x164] ss:$16 sps:$4 sm:$0xff]  }
  0xdc   :  { %1392 = vmatprep.subr.bf16.mxu0 %v3712_v7  ;;  %1564 = vmatprep.subr.bf16.mxu1 %v3715_v8  ;;  %v3799_v7 = vld [vmem:[#allocation4 + $0x16c] ss:$16 sps:$4 sm:$0xff]   ;;  %v3794_v8 = vld [vmem:[#allocation4 + $0x160] ss:$16 sps:$4 sm:$0xff]  }
  0xdf   :  { %1393 = vmatpush1.bf16.msra.mxu0 %v3710_v9  ;;  %1565 = vmatpush1.bf16.msra.mxu1 %v3713_v10  ;;  %v3797_v9 = vld [vmem:[#allocation4 + $0x168] ss:$16 sps:$4 sm:$0xff]   ;;  %v3802_v10 = vld [vmem:[#allocation4 + $0x184] ss:$16 sps:$4 sm:$0xff]  }
  0xe0   :  { %1394 = vmatprep.subr.bf16.mxu0 %v3718_v11  ;;  %1566 = vmatprep.subr.bf16.mxu1 %v3721_v12  ;;  %v3805_v11 = vld [vmem:[#allocation4 + $0x18c] ss:$16 sps:$4 sm:$0xff]   ;;  %v3800_v12 = vld [vmem:[#allocation4 + $0x180] ss:$16 sps:$4 sm:$0xff]  }
  0xe3   :  { %1395 = vmatpush1.bf16.msra.mxu0 %v3716_v13  ;;  %1567 = vmatpush1.bf16.msra.mxu1 %v3719_v14  ;;  %v3803_v13 = vld [vmem:[#allocation4 + $0x188] ss:$16 sps:$4 sm:$0xff]   ;;  %v3808_v14 = vld [vmem:[#allocation4 + $0x1a4] ss:$16 sps:$4 sm:$0xff]  }
  0xe4   :  { %1407 = vmatprep.subr.bf16.mxu0 %v3724_v17  ;;  %1579 = vmatprep.subr.bf16.mxu1 %v3727_v18  ;;  %v3809_v17 = vld [vmem:[#allocation4 + $0x1a8] ss:$16 sps:$4 sm:$0xff]   ;;  %v3814_v18 = vld [vmem:[#allocation4 + $0x1c4] ss:$16 sps:$4 sm:$0xff]  }
  0xe6   :  { %1397 = vmatmul.mubr.bf16.vlgmr.msra.gmra.mrb[0].mxu0 %v73_v21  ;;  %1569 = vmatmul.mubr.bf16.vlgmr.msra.gmra.mrb[0].mxu1 %v73_v21  ;;  %v3815_v21 = vld [vmem:[#allocation4 + $0x1c8] ss:$16 sps:$4 sm:$0xff]  }
  0xe7   :  { %1408 = vmatpush1.bf16.msra.mxu0 %v3722_v19  ;;  %1580 = vmatpush1.bf16.msra.mxu1 %v3725_v20  ;;  %v3817_v19 = vld [vmem:[#allocation4 + $0x1cc] ss:$16 sps:$4 sm:$0xff]   ;;  %v3812_v20 = vld [vmem:[#allocation4 + $0x1c0] ss:$16 sps:$4 sm:$0xff]  }
  0xe8   :  { %1439 = vmatprep.mubr.bf16.mxu0 %v4004_v24  ;;  %1611 = vmatprep.mubr.bf16.mxu1 %v4004_v24  ;;  %v3818_v24 = vld [vmem:[#allocation4 + $0x1e0] ss:$16 sps:$4 sm:$0xff]  }
  0xe9   :  { %2424 = vmatprep.subr.bf16.mxu0 %v3730_v22  ;;  %2510 = vmatprep.subr.bf16.mxu1 %v3733_v23  ;;  %v3820_v22 = vld [vmem:[#allocation4 + $0x1e4] ss:$16 sps:$4 sm:$0xff]   ;;  %v3823_v23 = vld [vmem:[#allocation4 + $0x1ec] ss:$16 sps:$4 sm:$0xff]  }
  0xf2   :  { %3165 = vmatmul.mubr.msk.bf16.vlgmr.msra.gmra.mrb[0].mxu0 %vm1274_vm0, %v75_v29  ;;  %3166 = vmatmul.mubr.msk.bf16.vlgmr.msra.gmra.mrb[0].mxu1 %vm1274_vm0, %v75_v29 }
  0xf3   :  { %2425 = vmatpush1.bf16.msra.mxu0 %v3728_v27  ;;  %2511 = vmatpush1.bf16.msra.mxu1 %v3731_v28  ;;  %v3829_v27 = vld [vmem:[#allocation4 + $0x20c] ss:$16 sps:$4 sm:$0xff]   ;;  %v274_v28 = vlaneseq }
  0xf4   :  { %2426 = vmatprep.subr.bf16.mxu0 %v3736_v30  ;;  %2512 = vmatprep.subr.bf16.mxu1 %v3739_v31 }
  0xf5   :  { %v4113_v29 = vshrl.u32 %v274_v28, 7  ;;  %v3863_v28 = vld [vmem:[#allocation4 + $0x2c8] ss:$16 sps:$4 sm:$0xff]  }
  0xf7   :  { %2427 = vmatpush1.bf16.msra.mxu0 %v3734_v32  ;;  %2513 = vmatpush1.bf16.msra.mxu1 %v3737_v33  ;;  %v276_v30 = vsub.s32 0, %v4113_v29  ;;  %v284_v31 = vsub.s32 2, %v4113_v29  ;;  %v272_v32 = vld [vmem:[%s4249_s2] sm:$0xf]  ;;  %v280_v33 = vsub.s32 1, %v4113_v29 }
  0xf8   :  { %2428 = vmatprep.subr.bf16.mxu0 %v3742_v34  ;;  %2514 = vmatprep.subr.bf16.mxu1 %v3745_v35  ;;  %v288_v34 = vsub.s32 3, %v4113_v29 }
  0xf9   :  { %v277_v35 = vrot.slane %v272_v32, %v276_v30 }
  0xfb   :  { %2429 = vmatpush1.bf16.msra.mxu0 %v3740_v36  ;;  %2515 = vmatpush1.bf16.msra.mxu1 %v3743_v37  ;;  %v285_v36 = vrot.slane %v272_v32, %v284_v31  ;;  %v281_v37 = vrot.slane %v272_v32, %v280_v33 }
  0xfc   :  { %2430 = vmatprep.subr.bf16.mxu0 %v3748_v38  ;;  %2516 = vmatprep.subr.bf16.mxu1 %v3751_v39  ;;  %v289_v38 = vrot.slane %v272_v32, %v288_v34  ;;  %v3868_v32 = vld [vmem:[#allocation4 + $0x2e4] ss:$16 sps:$4 sm:$0xff]  }
  0xff   :  { %2431 = vmatpush1.bf16.msra.mxu0 %v3746_v40  ;;  %2517 = vmatpush1.bf16.msra.mxu1 %v3749_v41 }
 0x100   :  { %2432 = vmatprep.subr.bf16.mxu0 %v3754_v42  ;;  %2518 = vmatprep.subr.bf16.mxu1 %v3757_v43 }
 0x103   :  { %2433 = vmatpush1.bf16.msra.mxu0 %v3752_v44  ;;  %2519 = vmatpush1.bf16.msra.mxu1 %v3755_v45 }
 0x104   :  { %2434 = vmatprep.subr.bf16.mxu0 %v3760_v46  ;;  %2520 = vmatprep.subr.bf16.mxu1 %v3763_v47 }
 0x107   :  { %2435 = vmatpush1.bf16.msra.mxu0 %v3758_v48  ;;  %2521 = vmatpush1.bf16.msra.mxu1 %v3761_v49 }
 0x108   :  { %2436 = vmatprep.subr.bf16.mxu0 %v3766_v50  ;;  %2522 = vmatprep.subr.bf16.mxu1 %v3769_v51 }
 0x10b   :  { %2437 = vmatpush1.bf16.msra.mxu0 %v3764_v52  ;;  %2523 = vmatpush1.bf16.msra.mxu1 %v3767_v53 }
 0x10c   :  { %2438 = vmatprep.subr.bf16.mxu0 %v3772_v54  ;;  %2524 = vmatprep.subr.bf16.mxu1 %v3775_v55 }
 0x10f   :  { %2439 = vmatpush1.bf16.msra.mxu0 %v3770_v56  ;;  %2525 = vmatpush1.bf16.msra.mxu1 %v3773_v57 }
 0x110   :  { %2440 = vmatprep.subr.bf16.mxu0 %v3778_v58  ;;  %2526 = vmatprep.subr.bf16.mxu1 %v3781_v59 }
 0x113   :  { %2441 = vmatpush1.bf16.msra.mxu0 %v3776_v60  ;;  %2527 = vmatpush1.bf16.msra.mxu1 %v3779_v61 }
 0x114   :  { %2442 = vmatprep.subr.bf16.mxu0 %v3784_v62  ;;  %2528 = vmatprep.subr.bf16.mxu1 %v3787_v63 }
 0x117   :  { %2443 = vmatpush1.bf16.msra.mxu0 %v3782_v0  ;;  %2529 = vmatpush1.bf16.msra.mxu1 %v3785_v1 }
 0x118   :  { %2444 = vmatprep.subr.bf16.mxu0 %v3790_v2  ;;  %2530 = vmatprep.subr.bf16.mxu1 %v3793_v3  ;;  %v3824_v3 = vld [vmem:[#allocation4 + $0x200] ss:$16 sps:$4 sm:$0xff]  }
 0x11b   :  { %2445 = vmatpush1.bf16.msra.mxu0 %v3788_v4  ;;  %2531 = vmatpush1.bf16.msra.mxu1 %v3791_v5  ;;  %v3827_v4 = vld [vmem:[#allocation4 + $0x208] ss:$16 sps:$4 sm:$0xff]   ;;  %v3832_v5 = vld [vmem:[#allocation4 + $0x224] ss:$16 sps:$4 sm:$0xff]  }
 0x11c   :  { %2446 = vmatprep.subr.bf16.mxu0 %v3796_v6  ;;  %2532 = vmatprep.subr.bf16.mxu1 %v3799_v7  ;;  %v3835_v6 = vld [vmem:[#allocation4 + $0x22c] ss:$16 sps:$4 sm:$0xff]   ;;  %v3830_v7 = vld [vmem:[#allocation4 + $0x220] ss:$16 sps:$4 sm:$0xff]  }
 0x11f   :  { %2447 = vmatpush1.bf16.msra.mxu0 %v3794_v8  ;;  %2533 = vmatpush1.bf16.msra.mxu1 %v3797_v9  ;;  %v3833_v8 = vld [vmem:[#allocation4 + $0x228] ss:$16 sps:$4 sm:$0xff]   ;;  %v3838_v9 = vld [vmem:[#allocation4 + $0x244] ss:$16 sps:$4 sm:$0xff]  }
 0x120   :  { %2448 = vmatprep.subr.bf16.mxu0 %v3802_v10  ;;  %2534 = vmatprep.subr.bf16.mxu1 %v3805_v11  ;;  %v3841_v10 = vld [vmem:[#allocation4 + $0x24c] ss:$16 sps:$4 sm:$0xff]   ;;  %v3836_v11 = vld [vmem:[#allocation4 + $0x240] ss:$16 sps:$4 sm:$0xff]  }
 0x123   :  { %2449 = vmatpush1.bf16.msra.mxu0 %v3800_v12  ;;  %2535 = vmatpush1.bf16.msra.mxu1 %v3803_v13  ;;  %v3839_v12 = vld [vmem:[#allocation4 + $0x248] ss:$16 sps:$4 sm:$0xff]   ;;  %v3844_v13 = vld [vmem:[#allocation4 + $0x264] ss:$16 sps:$4 sm:$0xff]  }
 0x124   :  { %2450 = vmatprep.subr.bf16.mxu0 %v3808_v14  ;;  %2536 = vmatprep.subr.bf16.mxu1 %v3811_v15  ;;  %v3847_v14 = vld [vmem:[#allocation4 + $0x26c] ss:$16 sps:$4 sm:$0xff]   ;;  %v3842_v15 = vld [vmem:[#allocation4 + $0x260] ss:$16 sps:$4 sm:$0xff]  }
 0x127   :  { %2451 = vmatpush1.bf16.msra.mxu0 %v3806_v16  ;;  %2537 = vmatpush1.bf16.msra.mxu1 %v3809_v17  ;;  %v3845_v16 = vld [vmem:[#allocation4 + $0x268] ss:$16 sps:$4 sm:$0xff]   ;;  %v3850_v17 = vld [vmem:[#allocation4 + $0x284] ss:$16 sps:$4 sm:$0xff]  }
 0x128   :  { %2452 = vmatprep.subr.bf16.mxu0 %v3814_v18  ;;  %2538 = vmatprep.subr.bf16.mxu1 %v3817_v19  ;;  %v3853_v18 = vld [vmem:[#allocation4 + $0x28c] ss:$16 sps:$4 sm:$0xff]   ;;  %v3848_v19 = vld [vmem:[#allocation4 + $0x280] ss:$16 sps:$4 sm:$0xff]  }
 0x12b   :  { %2453 = vmatpush1.bf16.msra.mxu0 %v3812_v20  ;;  %2539 = vmatpush1.bf16.msra.mxu1 %v3815_v21  ;;  %v3851_v20 = vld [vmem:[#allocation4 + $0x288] ss:$16 sps:$4 sm:$0xff]   ;;  %v3856_v21 = vld [vmem:[#allocation4 + $0x2a4] ss:$16 sps:$4 sm:$0xff]  }
 0x12c   :  { %2454 = vmatprep.subr.bf16.mxu0 %v3820_v22  ;;  %2540 = vmatprep.subr.bf16.mxu1 %v3823_v23  ;;  %v3859_v22 = vld [vmem:[#allocation4 + $0x2ac] ss:$16 sps:$4 sm:$0xff]   ;;  %v3854_v23 = vld [vmem:[#allocation4 + $0x2a0] ss:$16 sps:$4 sm:$0xff]  }
 0x12f   :  { %2455 = vmatpush1.bf16.msra.mxu0 %v3818_v24  ;;  %2541 = vmatpush1.bf16.msra.mxu1 %v3821_v25  ;;  %v3857_v24 = vld [vmem:[#allocation4 + $0x2a8] ss:$16 sps:$4 sm:$0xff]   ;;  %v3862_v25 = vld [vmem:[#allocation4 + $0x2c4] ss:$16 sps:$4 sm:$0xff]  }
 0x130   :  { %2467 = vmatprep.subr.bf16.mxu0 %v3826_v26  ;;  %2553 = vmatprep.subr.bf16.mxu1 %v3829_v27  ;;  %v3865_v26 = vld [vmem:[#allocation4 + $0x2cc] ss:$16 sps:$4 sm:$0xff]   ;;  %v3860_v27 = vld [vmem:[#allocation4 + $0x2c0] ss:$16 sps:$4 sm:$0xff]  }
 0x1c5   :  { %v1441_v39 = vpop.f32.mrb[0].mxu0  ;;  %v1613_v40 = vpop.f32.mrb[0].mxu1 }
 0x1c6   :  { %v3381_v41 = vadd.f32 %v1441_v39, %v277_v35  ;;  %v3385_v42 = vadd.f32 %v1613_v40, %v285_v36  ;;  %v1443_v43 = vpop.f32.mrb[1].mxu0  ;;  %v1615_v44 = vpop.f32.mrb[1].mxu1  ;;  %v3877_v39 = vld [vmem:[#allocation4 + $0x30c] ss:$16 sps:$4 sm:$0xff]   ;;  %v3872_v40 = vld [vmem:[#allocation4 + $0x300] ss:$16 sps:$4 sm:$0xff]  }
 0x1c7   :  { %v3382_v45 = vadd.f32 %v1443_v43, %v281_v37  ;;  %v3386_v46 = vadd.f32 %v1615_v44, %v289_v38  ;;  %v1445_v47 = vpop.f32.mrb[2].mxu0  ;;  %v1617_v48 = vpop.f32.mrb[2].mxu1  ;;  %v3883_v43 = vld [vmem:[#allocation4 + $0x32c] ss:$16 sps:$4 sm:$0xff]   ;;  %v3878_v44 = vld [vmem:[#allocation4 + $0x320] ss:$16 sps:$4 sm:$0xff]  }
 0x1c8   :  { %v3383_v49 = vadd.f32 %v1445_v47, %v277_v35  ;;  %v3387_v50 = vadd.f32 %v1617_v48, %v285_v36  ;;  %v1447_v51 = vpop.f32.mrb[3].mxu0  ;;  %v1619_v52 = vpop.f32.mrb[3].mxu1  ;;  %v1622_v55 = vmax.f32 %v3381_v41, 0.0  ;;  %v1624_v56 = vmax.f32 %v3385_v42, 0.0  ;;  %v3871_v35 = vld [vmem:[#allocation4 + $0x2ec] ss:$16 sps:$4 sm:$0xff]  }
 0x1c9   :  { %v3384_v53 = vadd.f32 %v1447_v51, %v281_v37  ;;  %v3388_v54 = vadd.f32 %v1619_v52, %v289_v38  ;;  %v1623_v59 = vmax.f32 %v3382_v45, 0.0  ;;  %v1625_v60 = vmax.f32 %v3386_v46, 0.0  ;;  %v3866_v36 = vld [vmem:[#allocation4 + $0x2e0] ss:$16 sps:$4 sm:$0xff]   ;;  %v3869_v37 = vld [vmem:[#allocation4 + $0x2e8] ss:$16 sps:$4 sm:$0xff]  }
 0x1ca   :  { %v1626_v57 = vmax.f32 %v3383_v49, 0.0  ;;  %v1628_v58 = vmax.f32 %v3387_v50, 0.0  ;;  %v3874_v38 = vld [vmem:[#allocation4 + $0x304] ss:$16 sps:$4 sm:$0xff]   ;;  %v3875_v41 = vld [vmem:[#allocation4 + $0x308] ss:$16 sps:$4 sm:$0xff]  }
 0x1cb   :  { %v1627_v61 = vmax.f32 %v3384_v53, 0.0  ;;  %v1629_v62 = vmax.f32 %v3388_v54, 0.0  ;;  %v3880_v42 = vld [vmem:[#allocation4 + $0x324] ss:$16 sps:$4 sm:$0xff]   ;;  %v3881_v45 = vld [vmem:[#allocation4 + $0x328] ss:$16 sps:$4 sm:$0xff]  }
 0x1cc   :  { %v1630_v63 = vpack.c.bf16 %v1626_v57, %v1622_v55  ;;  %v4130_v0 = vpack.c.bf16 %v1628_v58, %v1624_v56  ;;  %v3886_v46 = vld [vmem:[#allocation4 + $0x344] ss:$16 sps:$4 sm:$0xff]   ;;  %v3889_v47 = vld [vmem:[#allocation4 + $0x34c] ss:$16 sps:$4 sm:$0xff]   ;;  %v3884_v48 = vld [vmem:[#allocation4 + $0x340] ss:$16 sps:$4 sm:$0xff]  }
 0x1cd   :  { %v1631_v1 = vpack.c.bf16 %v1627_v61, %v1623_v59  ;;  %v1633_v2 = vpack.c.bf16 %v1629_v62, %v1625_v60  ;;  %v3887_v49 = vld [vmem:[#allocation4 + $0x348] ss:$16 sps:$4 sm:$0xff]   ;;  %v3892_v50 = vld [vmem:[#allocation4 + $0x364] ss:$16 sps:$4 sm:$0xff]   ;;  %v3895_v51 = vld [vmem:[#allocation4 + $0x36c] ss:$16 sps:$4 sm:$0xff]  }
 0x1ce   :  { %v3890_v52 = vld [vmem:[#allocation4 + $0x360] ss:$16 sps:$4 sm:$0xff]   ;;  %v3893_v53 = vld [vmem:[#allocation4 + $0x368] ss:$16 sps:$4 sm:$0xff]   ;;  %v3898_v54 = vld [vmem:[#allocation4 + $0x384] ss:$16 sps:$4 sm:$0xff]  }
 0x1cf   :  { %2456 = vmatprep.mubr.bf16.mxu0 %v1631_v1  ;;  %2542 = vmatprep.mubr.bf16.mxu1 %v1631_v1  ;;  %v3901_v55 = vld [vmem:[#allocation4 + $0x38c] ss:$16 sps:$4 sm:$0xff]   ;;  %v3896_v56 = vld [vmem:[#allocation4 + $0x380] ss:$16 sps:$4 sm:$0xff]   ;;  %v3899_v57 = vld [vmem:[#allocation4 + $0x388] ss:$16 sps:$4 sm:$0xff]  }
 0x1d0   :  { %2457 = vmatmul.mubr.bf16.vlgmr.msra.gmra.mrb[4].mxu0 %v1630_v63  ;;  %2543 = vmatmul.mubr.bf16.vlgmr.msra.gmra.mrb[4].mxu1 %v1630_v63  ;;  %v3904_v58 = vld [vmem:[#allocation4 + $0x3a4] ss:$16 sps:$4 sm:$0xff]   ;;  %v3907_v59 = vld [vmem:[#allocation4 + $0x3ac] ss:$16 sps:$4 sm:$0xff]   ;;  %v3902_v60 = vld [vmem:[#allocation4 + $0x3a0] ss:$16 sps:$4 sm:$0xff]  }
 0x1d1   :  { %2468 = vmatpush1.bf16.msra.mxu0 %v3824_v3  ;;  %2554 = vmatpush1.bf16.msra.mxu1 %v3827_v4  ;;  %v3905_v61 = vld [vmem:[#allocation4 + $0x3a8] ss:$16 sps:$4 sm:$0xff]   ;;  %v3910_v62 = vld [vmem:[#allocation4 + $0x3c4] ss:$16 sps:$4 sm:$0xff]   ;;  %v3913_v63 = vld [vmem:[#allocation4 + $0x3cc] ss:$16 sps:$4 sm:$0xff]  }
 0x1d2   :  { %2499 = vmatprep.mubr.bf16.mxu0 %v1633_v2  ;;  %2585 = vmatprep.mubr.bf16.mxu1 %v1633_v2  ;;  %v3908_v1 = vld [vmem:[#allocation4 + $0x3c0] ss:$16 sps:$4 sm:$0xff]   ;;  %v3911_v2 = vld [vmem:[#allocation4 + $0x3c8] ss:$16 sps:$4 sm:$0xff]   ;;  %v3916_v3 = vld [vmem:[#allocation4 + $0x3e4] ss:$16 sps:$4 sm:$0xff]  }
 0x1d3   :  { %2469 = vmatprep.subr.bf16.mxu0 %v3832_v5  ;;  %2555 = vmatprep.subr.bf16.mxu1 %v3835_v6  ;;  %v3919_v4 = vld [vmem:[#allocation4 + $0x3ec] ss:$16 sps:$4 sm:$0xff]   ;;  %v3914_v5 = vld [vmem:[#allocation4 + $0x3e0] ss:$16 sps:$4 sm:$0xff]   ;;  %v3917_v6 = vld [vmem:[#allocation4 + $0x3e8] ss:$16 sps:$4 sm:$0xff]  }
 0x1d5   :  { %2470 = vmatpush1.bf16.msra.mxu0 %v3830_v7  ;;  %2556 = vmatpush1.bf16.msra.mxu1 %v3833_v8  ;;  %v3920_v7 = vld [vmem:[%s4252_s5 + $0x40] sm:$0xff]  }
 0x1d6   :  { %2471 = vmatprep.subr.bf16.mxu0 %v3838_v9  ;;  %2557 = vmatprep.subr.bf16.mxu1 %v3841_v10  ;;  %v3921_v8 = vld [vmem:[%s4252_s5 + $0xc0] sm:$0xff]  }
 0x1d7   :  { %v3922_v9 = vld [vmem:[%s4252_s5] sm:$0xff]  }
 0x1d8   :  { %v3923_v10 = vld [vmem:[%s4252_s5 + $0x80] sm:$0xff]  }
 0x1d9   :  { %2472 = vmatpush1.bf16.msra.mxu0 %v3836_v11  ;;  %2558 = vmatpush1.bf16.msra.mxu1 %v3839_v12  ;;  %v3924_v11 = vld [vmem:[%s4252_s5 + $0x48] sm:$0xff]  }
 0x1da   :  { %2473 = vmatprep.subr.bf16.mxu0 %v3844_v13  ;;  %2559 = vmatprep.subr.bf16.mxu1 %v3847_v14  ;;  %v3925_v12 = vld [vmem:[%s4252_s5 + $0xc8] sm:$0xff]  }
 0x1db   :  { %v3926_v13 = vld [vmem:[%s4252_s5 + $0x8] sm:$0xff]  }
 0x1dc   :  { %v3927_v14 = vld [vmem:[%s4252_s5 + $0x88] sm:$0xff]  }
 0x1dd   :  { %2474 = vmatpush1.bf16.msra.mxu0 %v3842_v15  ;;  %2560 = vmatpush1.bf16.msra.mxu1 %v3845_v16  ;;  %v3928_v15 = vld [vmem:[%s4252_s5 + $0x50] sm:$0xff]  }
 0x1de   :  { %2475 = vmatprep.subr.bf16.mxu0 %v3850_v17  ;;  %2561 = vmatprep.subr.bf16.mxu1 %v3853_v18  ;;  %v3930_v16 = vld [vmem:[%s4252_s5 + $0x10] sm:$0xff]   ;;  %v3932_v18 = vld [vmem:[%s4252_s5 + $0x58] sm:$0xff]  }
 0x1df   :  { %v3931_v17 = vld [vmem:[%s4252_s5 + $0x90] sm:$0xff]  }
 0x1e1   :  { %2476 = vmatpush1.bf16.msra.mxu0 %v3848_v19  ;;  %2562 = vmatpush1.bf16.msra.mxu1 %v3851_v20  ;;  %v3933_v19 = vld [vmem:[%s4252_s5 + $0xd8] sm:$0xff]  }
 0x1e2   :  { %2477 = vmatprep.subr.bf16.mxu0 %v3856_v21  ;;  %2563 = vmatprep.subr.bf16.mxu1 %v3859_v22  ;;  %v3934_v20 = vld [vmem:[%s4252_s5 + $0x18] sm:$0xff]   ;;  %v3936_v22 = vld [vmem:[%s4252_s5 + $0x60] sm:$0xff]  }
 0x1e3   :  { %v3935_v21 = vld [vmem:[%s4252_s5 + $0x98] sm:$0xff]  }
 0x1e5   :  { %2478 = vmatpush1.bf16.msra.mxu0 %v3854_v23  ;;  %2564 = vmatpush1.bf16.msra.mxu1 %v3857_v24  ;;  %v3937_v23 = vld [vmem:[%s4252_s5 + $0xe0] sm:$0xff]  }
 0x1e6   :  { %2479 = vmatprep.subr.bf16.mxu0 %v3862_v25  ;;  %2565 = vmatprep.subr.bf16.mxu1 %v3865_v26  ;;  %v3938_v24 = vld [vmem:[%s4252_s5 + $0x20] sm:$0xff]   ;;  %v3940_v26 = vld [vmem:[%s4252_s5 + $0x68] sm:$0xff]  }
 0x1e7   :  { %v3939_v25 = vld [vmem:[%s4252_s5 + $0xa0] sm:$0xff]  }
 0x1e9   :  { %2480 = vmatpush1.bf16.msra.mxu0 %v3860_v27  ;;  %2566 = vmatpush1.bf16.msra.mxu1 %v3863_v28  ;;  %v3941_v27 = vld [vmem:[%s4252_s5 + $0xe8] sm:$0xff]  }
 0x1ea   :  { %2481 = vmatprep.subr.bf16.mxu0 %v3868_v32  ;;  %2567 = vmatprep.subr.bf16.mxu1 %v3871_v35  ;;  %v3942_v28 = vld [vmem:[%s4252_s5 + $0x28] sm:$0xff]   ;;  %v3944_v35 = vld [vmem:[%s4252_s5 + $0x70] sm:$0xff]  }
 0x1eb   :  { %v3943_v32 = vld [vmem:[%s4252_s5 + $0xa8] sm:$0xff]  }
 0x1ed   :  { %2482 = vmatpush1.bf16.msra.mxu0 %v3866_v36  ;;  %2568 = vmatpush1.bf16.msra.mxu1 %v3869_v37  ;;  %v3945_v36 = vld [vmem:[%s4252_s5 + $0xf0] sm:$0xff]  }
 0x1ee   :  { %2483 = vmatprep.subr.bf16.mxu0 %v3874_v38  ;;  %2569 = vmatprep.subr.bf16.mxu1 %v3877_v39  ;;  %v3946_v37 = vld [vmem:[%s4252_s5 + $0x30] sm:$0xff]   ;;  %v3948_v39 = vld [vmem:[%s4252_s5 + $0x78] sm:$0xff]  }
 0x1ef   :  { %v3947_v38 = vld [vmem:[%s4252_s5 + $0xb0] sm:$0xff]  }
 0x1f1   :  { %2484 = vmatpush1.bf16.msra.mxu0 %v3872_v40  ;;  %2570 = vmatpush1.bf16.msra.mxu1 %v3875_v41  ;;  %v3949_v40 = vld [vmem:[%s4252_s5 + $0xf8] sm:$0xff]  }
 0x1f2   :  { %2485 = vmatprep.subr.bf16.mxu0 %v3880_v42  ;;  %2571 = vmatprep.subr.bf16.mxu1 %v3883_v43  ;;  %v3950_v41 = vld [vmem:[%s4252_s5 + $0x38] sm:$0xff]   ;;  %v1762_v43 = vld [vmem:[%s4251_s4] sm:$0xf] }
 0x1f3   :  { %v3951_v42 = vld [vmem:[%s4252_s5 + $0xb8] sm:$0xff]  }
 0x1f5   :  { %2486 = vmatpush1.bf16.msra.mxu0 %v3878_v44  ;;  %2572 = vmatpush1.bf16.msra.mxu1 %v3881_v45  ;;  %v1767_v44 = vrot.slane %v1762_v43, %v276_v30  ;;  %v1775_v45 = vrot.slane %v1762_v43, %v284_v31 }
 0x1f6   :  { %2487 = vmatprep.subr.bf16.mxu0 %v3886_v46  ;;  %2573 = vmatprep.subr.bf16.mxu1 %v3889_v47  ;;  %v1771_v46 = vrot.slane %v1762_v43, %v280_v33  ;;  %v1779_v47 = vrot.slane %v1762_v43, %v288_v34 }
 0x1f9   :  { %2488 = vmatpush1.bf16.msra.mxu0 %v3884_v48  ;;  %2574 = vmatpush1.bf16.msra.mxu1 %v3887_v49 }
 0x1fa   :  { %2489 = vmatprep.subr.bf16.mxu0 %v3892_v50  ;;  %2575 = vmatprep.subr.bf16.mxu1 %v3895_v51 }
 0x1fd   :  { %2490 = vmatpush1.bf16.msra.mxu0 %v3890_v52  ;;  %2576 = vmatpush1.bf16.msra.mxu1 %v3893_v53 }
 0x1fe   :  { %2491 = vmatprep.subr.bf16.mxu0 %v3898_v54  ;;  %2577 = vmatprep.subr.bf16.mxu1 %v3901_v55 }
 0x201   :  { %2492 = vmatpush1.bf16.msra.mxu0 %v3896_v56  ;;  %2578 = vmatpush1.bf16.msra.mxu1 %v3899_v57 }
 0x202   :  { %2493 = vmatprep.subr.bf16.mxu0 %v3904_v58  ;;  %2579 = vmatprep.subr.bf16.mxu1 %v3907_v59 }
 0x205   :  { %2494 = vmatpush1.bf16.msra.mxu0 %v3902_v60  ;;  %2580 = vmatpush1.bf16.msra.mxu1 %v3905_v61 }
 0x206   :  { %2495 = vmatprep.subr.bf16.mxu0 %v3910_v62  ;;  %2581 = vmatprep.subr.bf16.mxu1 %v3913_v63 }
 0x209   :  { %2496 = vmatpush1.bf16.msra.mxu0 %v3908_v1  ;;  %2582 = vmatpush1.bf16.msra.mxu1 %v3911_v2 }
 0x20a   :  { %2497 = vmatprep.subr.bf16.mxu0 %v3916_v3  ;;  %2583 = vmatprep.subr.bf16.mxu1 %v3919_v4 }
 0x20d   :  { %2498 = vmatpush1.bf16.msra.mxu0 %v3914_v5  ;;  %2584 = vmatpush1.bf16.msra.mxu1 %v3917_v6 }
 0x20e   :  { %3337 = vmatprep.subr.bf16.mxu0 %v3920_v7  ;;  %3359 = vmatprep.subr.bf16.mxu1 %v3921_v8 }
 0x210   :  { %2500 = vmatmul.mubr.bf16.vlgmr.msra.gmra.mrb[4].mxu0 %v4130_v0  ;;  %2586 = vmatmul.mubr.bf16.vlgmr.msra.gmra.mrb[4].mxu1 %v4130_v0  ;;  %v3929_v0 = vld [vmem:[%s4252_s5 + $0xd0] sm:$0xff]  }
 0x211   :  { %3338 = vmatpush3.bf16.msra.mxu0 %v3922_v9  ;;  %3360 = vmatpush3.bf16.msra.mxu1 %v3923_v10  ;;  %v3295_v10 = vld [vmem:[%s4253_s6] ss:$0 sm:$0xff] }
 0x212   :  { %3339 = vmatprep.subr.bf16.mxu0 %v3924_v11  ;;  %3361 = vmatprep.subr.bf16.mxu1 %v3925_v12 }
 0x215   :  { %3340 = vmatpush3.bf16.msra.mxu0 %v3926_v13  ;;  %3362 = vmatpush3.bf16.msra.mxu1 %v3927_v14 }
 0x216   :  { %3341 = vmatprep.subr.bf16.mxu0 %v3928_v15  ;;  %3363 = vmatprep.subr.bf16.mxu1 %v3929_v0 }
 0x219   :  { %3342 = vmatpush3.bf16.msra.mxu0 %v3930_v16  ;;  %3364 = vmatpush3.bf16.msra.mxu1 %v3931_v17 }
 0x21a   :  { %3343 = vmatprep.subr.bf16.mxu0 %v3932_v18  ;;  %3365 = vmatprep.subr.bf16.mxu1 %v3933_v19 }
 0x21d   :  { %3344 = vmatpush3.bf16.msra.mxu0 %v3934_v20  ;;  %3366 = vmatpush3.bf16.msra.mxu1 %v3935_v21 }
 0x21e   :  { %3345 = vmatprep.subr.bf16.mxu0 %v3936_v22  ;;  %3367 = vmatprep.subr.bf16.mxu1 %v3937_v23 }
 0x221   :  { %3346 = vmatpush3.bf16.msra.mxu0 %v3938_v24  ;;  %3368 = vmatpush3.bf16.msra.mxu1 %v3939_v25 }
 0x222   :  { %3347 = vmatprep.subr.bf16.mxu0 %v3940_v26  ;;  %3369 = vmatprep.subr.bf16.mxu1 %v3941_v27 }
 0x225   :  { %3348 = vmatpush3.bf16.msra.mxu0 %v3942_v28  ;;  %3370 = vmatpush3.bf16.msra.mxu1 %v3943_v32 }
 0x226   :  { %3349 = vmatprep.subr.bf16.mxu0 %v3944_v35  ;;  %3371 = vmatprep.subr.bf16.mxu1 %v3945_v36 }
 0x229   :  { %3350 = vmatpush3.bf16.msra.mxu0 %v3946_v37  ;;  %3372 = vmatpush3.bf16.msra.mxu1 %v3947_v38 }
 0x22a   :  { %3351 = vmatprep.subr.bf16.mxu0 %v3948_v39  ;;  %3373 = vmatprep.subr.bf16.mxu1 %v3949_v40 }
 0x22d   :  { %3352 = vmatpush3.bf16.msra.mxu0 %v3950_v41  ;;  %3374 = vmatpush3.bf16.msra.mxu1 %v3951_v42 }
 0x2e3   :  { %v2501_v48 = vpop.f32.mrb[4].mxu0  ;;  %v2587_v49 = vpop.f32.mrb[4].mxu1 }
 0x2e4   :  { %v3389_v50 = vadd.f32 %v2501_v48, %v1767_v44  ;;  %v3393_v51 = vadd.f32 %v2587_v49, %v1775_v45  ;;  %v2503_v52 = vpop.f32.mrb[5].mxu0  ;;  %v2589_v53 = vpop.f32.mrb[5].mxu1 }
 0x2e5   :  { %v3390_v54 = vadd.f32 %v2503_v52, %v1771_v46  ;;  %v3394_v55 = vadd.f32 %v2589_v53, %v1779_v47  ;;  %v2505_v56 = vpop.f32.mrb[6].mxu0  ;;  %v2591_v57 = vpop.f32.mrb[6].mxu1 }
 0x2e6   :  { %v3391_v30 = vadd.f32 %v2505_v56, %v1767_v44  ;;  %v3395_v58 = vadd.f32 %v2591_v57, %v1775_v45  ;;  %v2507_v59 = vpop.f32.mrb[7].mxu0  ;;  %v2593_v31 = vpop.f32.mrb[7].mxu1  ;;  %v2596_v33 = vmax.f32 %v3389_v50, 0.0  ;;  %v2598_v62 = vmax.f32 %v3393_v51, 0.0 }
 0x2e7   :  { %v3392_v60 = vadd.f32 %v2507_v59, %v1771_v46  ;;  %v3396_v61 = vadd.f32 %v2593_v31, %v1779_v47  ;;  %v2597_v63 = vmax.f32 %v3390_v54, 0.0  ;;  %v2599_v1 = vmax.f32 %v3394_v55, 0.0 }
 0x2e8   :  { %v2600_v29 = vmax.f32 %v3391_v30, 0.0  ;;  %v2602_v34 = vmax.f32 %v3395_v58, 0.0 }
 0x2e9   :  { %v2601_v2 = vmax.f32 %v3392_v60, 0.0  ;;  %v2603_v3 = vmax.f32 %v3396_v61, 0.0 }
 0x2ea   :  { %v2604_v4 = vpack.c.bf16 %v2600_v29, %v2596_v33  ;;  %v2606_v5 = vpack.c.bf16 %v2602_v34, %v2598_v62 }
 0x2eb   :  { %v2605_v6 = vpack.c.bf16 %v2601_v2, %v2597_v63  ;;  %v2607_v7 = vpack.c.bf16 %v2603_v3, %v2599_v1 }
 0x2ed   :  { %2903 = vmatprep.mubr.bf16.mxu0 %v2605_v6  ;;  %2944 = vmatprep.mubr.bf16.mxu1 %v2607_v7 }
 0x2ee   :  { %2904 = vmatmul.mubr.bf16.vlgmr.msra.gmra.mrb[8].mxu0 %v2604_v4  ;;  %2945 = vmatmul.mubr.bf16.vlgmr.msra.gmra.mrb[8].mxu1 %v2606_v5 }
 0x3c1   :  { %v3353_v8 = vpop.f32.mrb[8].mxu0  ;;  %v3375_v9 = vpop.f32.mrb[8].mxu1 }
 0x3c2   :  { %v3354_v11 = vpop.f32.mrb[9].mxu0  ;;  %v3376_v12 = vpop.f32.mrb[9].mxu1 }
 0x3c3   :  { %v3355_v13 = vadd.f32 %v3354_v11, %v3353_v8  ;;  %v3377_v14 = vadd.f32 %v3376_v12, %v3375_v9  ;;  %v3356_v15 = vpop.f32.mrb[10].mxu0  ;;  %v3378_v0 = vpop.f32.mrb[10].mxu1 }
 0x3c4   :  { %v3357_v16 = vpop.f32.mrb[11].mxu0  ;;  %v3379_v17 = vpop.f32.mrb[11].mxu1 }
 0x3c5   :  { %v2906_v18 = vadd.f32 %v3355_v13, %v3295_v10  ;;  %v3358_v19 = vadd.f32 %v3357_v16, %v3356_v15  ;;  %v3380_v20 = vadd.f32 %v3379_v17, %v3378_v0 }
 0x3c7   :  { %v2947_v21 = vadd.f32 %v3377_v14, %v2906_v18  ;;  %v2909_v22 = vadd.f32 %v3358_v19, %v3295_v10 }
 0x3c9   :  { %v2950_v23 = vadd.f32 %v3380_v20, %v2909_v22 }
 0x3cb   :  { %v3335_v24 = vpack.c.bf16 %v2950_v23, %v2947_v21 }
 0x3cd   :  { %3336 = vst [vmem:[%s4254_s7] sm:$0xff] %v3335_v24  }
 0x3ce   :  { %2967 = vsyncpa [#allocation3], 1 }
 0x3cf   :  { %2968 = vsyncpa [#allocation5], 1 }

</bundles_post_ra>
